<compile_context>
chip_gen: v6e
topology: v6e:2x2x1
jax: 0.10.0
libtpu: 0.0.40
codegen_flags: <defaults>
</compile_context>

<pallas_src>
import functools

import jax
import jax.numpy as jnp
from jax.experimental import pallas as pl
from jax.experimental.pallas import tpu as pltpu

D_IN, H1, H2, D_OUT = 100, 256, 512, 784
D_IN_PAD = 128  # lane-aligned K for the first matmul (zero-padded columns)


def _generator_mlp_kernel(x_ref, w1_ref, b1_ref, w2_ref, b2_ref,
                          w3_ref, b3_ref, o_ref):
    """Fused 3-layer MLP (Linear+ReLU, Linear+ReLU, Linear+Tanh).

    One batch tile per grid step; all bf16 weights stay VMEM-resident.
    MXU runs bf16 x bf16 with f32 accumulation; bias adds in f32; the final
    tanh + store run in the output dtype (bf16 EUP path on v6e/v7x).
    """
    # Layer 1: (bm,128) @ (128,256) + (1,256) -> ReLU
    h1 = jnp.dot(x_ref[...], w1_ref[...], preferred_element_type=jnp.float32)
    h1 = jnp.maximum(h1 + b1_ref[...], 0.0)

    # Layer 2: (bm,256) @ (256,512) + (1,512) -> ReLU
    h2 = jnp.dot(h1.astype(w2_ref.dtype), w2_ref[...],
                 preferred_element_type=jnp.float32)
    h2 = jnp.maximum(h2 + b2_ref[...], 0.0)

    # Layer 3: (bm,512) @ (512,784) + (1,784) -> Tanh
    h3 = jnp.dot(h2.astype(w3_ref.dtype), w3_ref[...],
                 preferred_element_type=jnp.float32)
    o_ref[...] = jnp.tanh((h3 + b3_ref[...]).astype(o_ref.dtype))


def _round_up(n, m):
    return ((n + m - 1) // m) * m


def _choose_tiling(B):
    """Pick (block_m, n_tiles) with minimal row padding.

    - B <= 256: one tile, rows rounded to a multiple of 16 (bf16 sublanes).
    - B  > 256: at least 2 tiles (feeds both v7x TensorCores), each capped at
      1024 rows (v7x VMEM headroom); tiles >= 512 rows are rounded to 128 for
      MXU row fill at negligible extra padding.
    """
    if B <= 256:
        return _round_up(max(B, 16), 16), 1
    n_tiles = max(2, pl.cdiv(B, 1024))
    block_m = min(1024, _round_up(pl.cdiv(B, n_tiles), 16))
    if block_m >= 512:
        block_m = min(1024, _round_up(block_m, 128))
    return block_m, n_tiles


def prepare_params(params):
    """One-time weight prep (hoisted out of the per-call forward).

    Casts weights to bf16, zero-pads w1's K dim 100 -> 128, reshapes biases
    to (1, N) f32.  Weights are stored (in_features, out_features).
    """
    w1 = jnp.zeros((D_IN_PAD, H1), jnp.bfloat16)
    w1 = w1.at[:D_IN, :].set(params["w1"].astype(jnp.bfloat16))
    return {
        "w1": w1,
        "b1": params["b1"].reshape(1, H1).astype(jnp.float32),
        "w2": params["w2"].astype(jnp.bfloat16),
        "b2": params["b2"].reshape(1, H2).astype(jnp.float32),
        "w3": params["w3"].astype(jnp.bfloat16),
        "b3": params["b3"].reshape(1, D_OUT).astype(jnp.float32),
    }


@functools.partial(jax.jit, static_argnames=("out_dtype",))
def generator_forward(x, prepped, *, out_dtype=jnp.bfloat16):
    """Runs the fused Generator MLP as a single Pallas kernel.

    x: (B, 100) float32.  prepped: output of prepare_params().
    out_dtype: bf16 by default (v6e/v7x are output-DMA bound); use
    jnp.float32 for strict f32 semantics / v5e.
    """
    B = x.shape[0]
    assert x.shape[1] == D_IN

    block_m, n_tiles = _choose_tiling(B)
    B_pad = block_m * n_tiles

    # Per-call input prep: bf16 cast + zero-pad 100 -> 128 cols (K dim) and
    # B -> B_pad rows (padding minimized by _choose_tiling).
    x_p = jnp.pad(x.astype(jnp.bfloat16),
                  ((0, B_pad - B), (0, D_IN_PAD - D_IN)))

    out_itemsize = jnp.dtype(out_dtype).itemsize
    flops = 2 * B_pad * (D_IN_PAD * H1 + H1 * H2 + H2 * D_OUT)
    bytes_accessed = (
        x_p.size * 2
        + (prepped["w1"].size + prepped["w2"].size + prepped["w3"].size) * 2
        + (prepped["b1"].size + prepped["b2"].size + prepped["b3"].size) * 4
        + B_pad * D_OUT * out_itemsize)
    cost = pl.CostEstimate(flops=flops, transcendentals=B_pad * D_OUT,
                           bytes_accessed=bytes_accessed)

    # Constant index maps -> weights fetched once, VMEM-resident across steps.
    in_specs = [
        pl.BlockSpec((block_m, D_IN_PAD), lambda i: (i, 0)),   # x tile
        pl.BlockSpec((D_IN_PAD, H1), lambda i: (0, 0)),        # w1
        pl.BlockSpec((1, H1), lambda i: (0, 0)),               # b1
        pl.BlockSpec((H1, H2), lambda i: (0, 0)),              # w2
        pl.BlockSpec((1, H2), lambda i: (0, 0)),               # b2
        pl.BlockSpec((H2, D_OUT), lambda i: (0, 0)),           # w3
        pl.BlockSpec((1, D_OUT), lambda i: (0, 0)),            # b3
    ]
    out_specs = pl.BlockSpec((block_m, D_OUT), lambda i: (i, 0))

    out = pl.pallas_call(
        _generator_mlp_kernel,
        out_shape=jax.ShapeDtypeStruct((B_pad, D_OUT), out_dtype),
        grid=(n_tiles,),
        in_specs=in_specs,
        out_specs=out_specs,
        compiler_params=pltpu.CompilerParams(
            dimension_semantics=("parallel",),       # v7x 2-TC sharding
            vmem_limit_bytes=48 * 1024 * 1024),      # > v5e/v7x scoped default
        cost_estimate=cost,
    )(x_p, prepped["w1"], prepped["b1"], prepped["w2"], prepped["b2"],
      prepped["w3"], prepped["b3"])

    # Column dim is already exactly 784; only trim padded rows if any.
    return out if B_pad == B else out[:B]


def init_generator_params(key):
    """Deterministic init mirroring PyTorch nn.Linear defaults:
    U(-1/sqrt(fan_in), 1/sqrt(fan_in)) for weight and bias.
    Weights are stored pre-transposed as (in_features, out_features)."""
    dims = [(D_IN, H1), (H1, H2), (H2, D_OUT)]
    params = {}
    for idx, (fan_in, fan_out) in enumerate(dims, start=1):
        key, kw, kb = jax.random.split(key, 3)
        bound = 1.0 / jnp.sqrt(jnp.float32(fan_in))
        params[f"w{idx}"] = jax.random.uniform(
            kw, (fan_in, fan_out), jnp.float32, -bound, bound)
        params[f"b{idx}"] = jax.random.uniform(
            kb, (fan_out,), jnp.float32, -bound, bound)
    return params


def _reference_forward(x, params):
    h = jnp.maximum(x @ params["w1"] + params["b1"], 0.0)
    h = jnp.maximum(h @ params["w2"] + params["b2"], 0.0)
    return jnp.tanh(h @ params["w3"] + params["b3"])


if __name__ == "__main__":
    key = jax.random.PRNGKey(0)
    key, kx1, kx2 = jax.random.split(key, 3)

    params = init_generator_params(key)
    prepped = prepare_params(params)   # one-time weight pad/cast

    # Small batch: single 16-row tile, default bf16 output (v6e/v7x path).
    B1 = 16
    x1 = jax.random.normal(kx1, (B1, D_IN), dtype=jnp.float32)
    out1 = jax.block_until_ready(generator_forward(x1, prepped))
    ref1 = _reference_forward(x1, params)
    assert out1.shape == (B1, D_OUT) and out1.dtype == jnp.bfloat16
    err1 = float(jnp.max(jnp.abs(out1.astype(jnp.float32) - ref1)))
    assert err1 < 5e-2, err1

    # Multi-tile path: 2 tiles x 160 rows (minimal padding), f32 output
    # (strict-parity / v5e configuration).
    B2 = 300
    x2 = jax.random.normal(kx2, (B2, D_IN), dtype=jnp.float32)
    out2 = jax.block_until_ready(
        generator_forward(x2, prepped, out_dtype=jnp.float32))
    ref2 = _reference_forward(x2, params)
    assert out2.shape == (B2, D_OUT) and out2.dtype == jnp.float32
    err2 = float(jnp.max(jnp.abs(out2 - ref2)))
    assert err2 < 7.5e-2, err2

    print("KERNEL_OK")
</pallas_src>

<mosaic_0001>
module attributes {stable_mosaic.version = 11 : i64} {
  func.func @_generator_mlp_kernel(%arg0: i32, %arg1: memref<16x128xbf16, #tpu.memory_space<vmem>>, %arg2: memref<128x256xbf16, #tpu.memory_space<vmem>>, %arg3: memref<1x256xf32, #tpu.memory_space<vmem>>, %arg4: memref<256x512xbf16, #tpu.memory_space<vmem>>, %arg5: memref<1x512xf32, #tpu.memory_space<vmem>>, %arg6: memref<512x784xbf16, #tpu.memory_space<vmem>>, %arg7: memref<1x784xf32, #tpu.memory_space<vmem>>, %arg8: memref<16x784xbf16, #tpu.memory_space<vmem>>) attributes {dimension_semantics = [#tpu.dimension_semantics<parallel>], iteration_bounds = array<i64: 1>, scalar_prefetch = 0 : i64, scratch_operands = 0 : i64, tpu.core_type = #tpu.core_type<tc>, window_params = [{transform_indices = @transform_0, window_bounds = array<i64: 16, 128>}, {pipeline_mode = #tpu.pipeline_mode<synchronous>, transform_indices = @transform_1, window_bounds = array<i64: 128, 256>}, {pipeline_mode = #tpu.pipeline_mode<synchronous>, transform_indices = @transform_2, window_bounds = array<i64: 1, 256>}, {pipeline_mode = #tpu.pipeline_mode<synchronous>, transform_indices = @transform_3, window_bounds = array<i64: 256, 512>}, {pipeline_mode = #tpu.pipeline_mode<synchronous>, transform_indices = @transform_4, window_bounds = array<i64: 1, 512>}, {pipeline_mode = #tpu.pipeline_mode<synchronous>, transform_indices = @transform_5, window_bounds = array<i64: 512, 784>}, {pipeline_mode = #tpu.pipeline_mode<synchronous>, transform_indices = @transform_6, window_bounds = array<i64: 1, 784>}, {transform_indices = @transform_7, window_bounds = array<i64: 16, 784>}]} {
    %c0 = arith.constant 0 : index
    %c0_0 = arith.constant 0 : index
    %0 = vector.load %arg1[%c0, %c0_0] : memref<16x128xbf16, #tpu.memory_space<vmem>>, vector<16x128xbf16>
    %c0_1 = arith.constant 0 : index
    %c0_2 = arith.constant 0 : index
    %1 = vector.load %arg2[%c0_1, %c0_2] : memref<128x256xbf16, #tpu.memory_space<vmem>>, vector<128x256xbf16>
    %cst = arith.constant dense<0.000000e+00> : vector<16x256xf32>
    %2 = tpu.matmul %0, %1, %cst {dimension_numbers = #tpu.dot_dimension_numbers<[1], [0], [0], [1], [0, 0, 1, 1], [], []>} : vector<16x128xbf16>, vector<128x256xbf16>, vector<16x256xf32> -> vector<16x256xf32>
    %c0_3 = arith.constant 0 : index
    %c0_4 = arith.constant 0 : index
    %3 = vector.load %arg3[%c0_3, %c0_4] : memref<1x256xf32, #tpu.memory_space<vmem>>, vector<1x256xf32>
    %4 = vector.broadcast %3 : vector<1x256xf32> to vector<16x256xf32>
    %5 = arith.addf %2, %4 : vector<16x256xf32>
    %cst_5 = arith.constant 0.000000e+00 : f32
    %6 = vector.broadcast %cst_5 : f32 to vector<16x256xf32>
    %7 = arith.maximumf %5, %6 : vector<16x256xf32>
    %8 = arith.truncf %7 : vector<16x256xf32> to vector<16x256xbf16>
    %c0_6 = arith.constant 0 : index
    %c0_7 = arith.constant 0 : index
    %9 = vector.load %arg4[%c0_6, %c0_7] : memref<256x512xbf16, #tpu.memory_space<vmem>>, vector<256x512xbf16>
    %cst_8 = arith.constant dense<0.000000e+00> : vector<16x512xf32>
    %10 = tpu.matmul %8, %9, %cst_8 {dimension_numbers = #tpu.dot_dimension_numbers<[1], [0], [0], [1], [0, 0, 1, 1], [], []>} : vector<16x256xbf16>, vector<256x512xbf16>, vector<16x512xf32> -> vector<16x512xf32>
    %c0_9 = arith.constant 0 : index
    %c0_10 = arith.constant 0 : index
    %11 = vector.load %arg5[%c0_9, %c0_10] : memref<1x512xf32, #tpu.memory_space<vmem>>, vector<1x512xf32>
    %12 = vector.broadcast %11 : vector<1x512xf32> to vector<16x512xf32>
    %13 = arith.addf %10, %12 : vector<16x512xf32>
    %cst_11 = arith.constant 0.000000e+00 : f32
    %14 = vector.broadcast %cst_11 : f32 to vector<16x512xf32>
    %15 = arith.maximumf %13, %14 : vector<16x512xf32>
    %16 = arith.truncf %15 : vector<16x512xf32> to vector<16x512xbf16>
    %c0_12 = arith.constant 0 : index
    %c0_13 = arith.constant 0 : index
    %17 = vector.load %arg6[%c0_12, %c0_13] : memref<512x784xbf16, #tpu.memory_space<vmem>>, vector<512x784xbf16>
    %cst_14 = arith.constant dense<0.000000e+00> : vector<16x784xf32>
    %18 = tpu.matmul %16, %17, %cst_14 {dimension_numbers = #tpu.dot_dimension_numbers<[1], [0], [0], [1], [0, 0, 1, 1], [], []>} : vector<16x512xbf16>, vector<512x784xbf16>, vector<16x784xf32> -> vector<16x784xf32>
    %c0_15 = arith.constant 0 : index
    %c0_16 = arith.constant 0 : index
    %19 = vector.load %arg7[%c0_15, %c0_16] : memref<1x784xf32, #tpu.memory_space<vmem>>, vector<1x784xf32>
    %20 = vector.broadcast %19 : vector<1x784xf32> to vector<16x784xf32>
    %21 = arith.addf %18, %20 : vector<16x784xf32>
    %22 = arith.truncf %21 : vector<16x784xf32> to vector<16x784xbf16>
    %23 = math.tanh %22 : vector<16x784xbf16>
    %c0_17 = arith.constant 0 : index
    %c0_18 = arith.constant 0 : index
    %24 = vector.load %arg8[%c0_17, %c0_18] : memref<16x784xbf16, #tpu.memory_space<vmem>>, vector<16x784xbf16>
    tpu.vector_store %arg8[%c0_17, %c0_18], %23 {strides = array<i32>} : memref<16x784xbf16, #tpu.memory_space<vmem>>, vector<16x784xbf16>,
    return
  }
  func.func @transform_0(%arg0: i32) -> (i32, i32) {
    %c0_i32 = arith.constant 0 : i32
    %c0_i32_0 = arith.constant 0 : i32
    return %arg0, %c0_i32 : i32, i32
  }
  func.func @transform_1(%arg0: i32) -> (i32, i32) {
    %c0_i32 = arith.constant 0 : i32
    %c0_i32_0 = arith.constant 0 : i32
    %c0_i32_1 = arith.constant 0 : i32
    return %c0_i32, %c0_i32_0 : i32, i32
  }
  func.func @transform_2(%arg0: i32) -> (i32, i32) {
    %c0_i32 = arith.constant 0 : i32
    %c0_i32_0 = arith.constant 0 : i32
    %c0_i32_1 = arith.constant 0 : i32
    return %c0_i32, %c0_i32_0 : i32, i32
  }
  func.func @transform_3(%arg0: i32) -> (i32, i32) {
    %c0_i32 = arith.constant 0 : i32
    %c0_i32_0 = arith.constant 0 : i32
    %c0_i32_1 = arith.constant 0 : i32
    return %c0_i32, %c0_i32_0 : i32, i32
  }
  func.func @transform_4(%arg0: i32) -> (i32, i32) {
    %c0_i32 = arith.constant 0 : i32
    %c0_i32_0 = arith.constant 0 : i32
    %c0_i32_1 = arith.constant 0 : i32
    return %c0_i32, %c0_i32_0 : i32, i32
  }
  func.func @transform_5(%arg0: i32) -> (i32, i32) {
    %c0_i32 = arith.constant 0 : i32
    %c0_i32_0 = arith.constant 0 : i32
    %c0_i32_1 = arith.constant 0 : i32
    return %c0_i32, %c0_i32_0 : i32, i32
  }
  func.func @transform_6(%arg0: i32) -> (i32, i32) {
    %c0_i32 = arith.constant 0 : i32
    %c0_i32_0 = arith.constant 0 : i32
    %c0_i32_1 = arith.constant 0 : i32
    return %c0_i32, %c0_i32_0 : i32, i32
  }
  func.func @transform_7(%arg0: i32) -> (i32, i32) {
    %c0_i32 = arith.constant 0 : i32
    %c0_i32_0 = arith.constant 0 : i32
    return %arg0, %c0_i32 : i32, i32
  }
}

</mosaic_0001>

<bundles_post_ra>
// kernel: generator_forward.1
= control target key start
LH: loop header
LB: loop body
LE: loop exit
PB: predicated region body
PF: predicated region fallthrough
CT: control target
= control target key end

     0   :  { %v3396_v2 = vmov 0   ;;  %s4427_s0 = inlined_call_operand.vmem [shape: bf16[16,128], index: 0, kind: input, shape index: {}]   ;;  %s4428_s1 = inlined_call_operand.vmem [shape: bf16[128,256], index: 1, kind: input, shape index: {}]   ;;  %s4429_s2 = inlined_call_operand.vmem [shape: f32[1,256], index: 2, kind: input, shape index: {}]   ;;  %s4430_s3 = inlined_call_operand.vmem [shape: bf16[256,512], index: 3, kind: input, shape index: {}]   ;;  %s4431_s4 = inlined_call_operand.vmem [shape: f32[1,512], index: 4, kind: input, shape index: {}]   ;;  %s4432_s5 = inlined_call_operand.vmem [shape: bf16[512,784], index: 5, kind: input, shape index: {}]   ;;  %s4433_s6 = inlined_call_operand.vmem [shape: f32[1,784], index: 6, kind: input, shape index: {}]   ;;  %s4434_s7 = inlined_call_operand.hbm [shape: bf16[16,784], index: 7, kind: output, shape index: {}]  }
   0x1   :  { %v2919_v0 = vld [vmem:[%s4428_s1 + $0x74] ss:$8 sps:$4 sm:$0xff]   ;;  %v2921_v1 = vld [vmem:[%s4428_s1 + $0x70] ss:$8 sps:$4 sm:$0xff]   ;;  %176 = vmatprep.mubr.bf16.mxu0 %v3396_v2  ;;  %v2922_v3 = vld [vmem:[%s4428_s1 + $0x64] ss:$8 sps:$4 sm:$0xff]  }
   0x2   :  { %144 = vmatprep.subr.bf16.mxu0 %v2919_v0  ;;  %v2924_v4 = vld [vmem:[%s4428_s1 + $0x60] ss:$8 sps:$4 sm:$0xff]   ;;  %v2925_v5 = vld [vmem:[%s4428_s1 + $0x54] ss:$8 sps:$4 sm:$0xff]   ;;  %v2927_v6 = vld [vmem:[%s4428_s1 + $0x50] ss:$8 sps:$4 sm:$0xff]  }
   0x3   :  { %145 = vmatpush1.bf16.msra.mxu0 %v2921_v1  ;;  %v2928_v7 = vld [vmem:[%s4428_s1 + $0x44] ss:$8 sps:$4 sm:$0xff]   ;;  %v2930_v8 = vld [vmem:[%s4428_s1 + $0x40] ss:$8 sps:$4 sm:$0xff]   ;;  %v2931_v9 = vld [vmem:[%s4428_s1 + $0x34] ss:$8 sps:$4 sm:$0xff]  }
   0x4   :  { %146 = vmatprep.subr.bf16.mxu0 %v2922_v3  ;;  %v2944_v10 = vld [vmem:[%s4430_s3 + $0xe4] ss:$16 sps:$4 sm:$0xff]   ;;  %v2933_v11 = vld [vmem:[%s4428_s1 + $0x30] ss:$8 sps:$4 sm:$0xff]   ;;  %v2936_v17 = vld [vmem:[%s4428_s1 + $0x20] ss:$8 sps:$4 sm:$0xff]  }
   0x5   :  { %599 = vmatprep.subr.bf16.mxu1 %v2944_v10  ;;  %v2949_v12 = vld [vmem:[%s4430_s3 + $0xe0] ss:$16 sps:$4 sm:$0xff]   ;;  %v2950_v13 = vld [vmem:[%s4430_s3 + $0xc4] ss:$16 sps:$4 sm:$0xff]   ;;  %v2948_v26 = vld [vmem:[%s4430_s3 + $0xec] ss:$16 sps:$4 sm:$0xff]  }
   0x6   :  { %v2934_v14 = vld [vmem:[%s4428_s1 + $0x24] ss:$8 sps:$4 sm:$0xff]   ;;  %600 = vmatpush1.bf16.msra.mxu1 %v2949_v12  ;;  %v2955_v15 = vld [vmem:[%s4430_s3 + $0xc0] ss:$16 sps:$4 sm:$0xff]   ;;  %v2937_v18 = vld [vmem:[%s4428_s1 + $0x14] ss:$8 sps:$4 sm:$0xff]  }
   0x7   :  { %147 = vmatpush1.bf16.msra.mxu0 %v2924_v4  ;;  %601 = vmatprep.subr.bf16.mxu1 %v2950_v13  ;;  %v2956_v16 = vld [vmem:[%s4430_s3 + $0xa4] ss:$16 sps:$4 sm:$0xff]   ;;  %v2961_v19 = vld [vmem:[%s4430_s3 + $0xa0] ss:$16 sps:$4 sm:$0xff]   ;;  %v2946_v30 = vld [vmem:[%s4430_s3 + $0xe8] ss:$16 sps:$4 sm:$0xff]  }
   0x8   :  { %148 = vmatprep.subr.bf16.mxu0 %v2925_v5  ;;  %v2962_v20 = vld [vmem:[%s4430_s3 + $0x84] ss:$16 sps:$4 sm:$0xff]   ;;  %v2939_v21 = vld [vmem:[%s4428_s1 + $0x10] ss:$8 sps:$4 sm:$0xff]   ;;  %v2942_v25 = vld [vmem:[%s4428_s1] ss:$8 sps:$4 sm:$0xff]  }
   0x9   :  { %v2940_v22 = vld [vmem:[%s4428_s1 + $0x4] ss:$8 sps:$4 sm:$0xff]   ;;  %v2967_v23 = vld [vmem:[%s4430_s3 + $0x80] ss:$16 sps:$4 sm:$0xff]   ;;  %v2952_v34 = vld [vmem:[%s4430_s3 + $0xc8] ss:$16 sps:$4 sm:$0xff]  }
   0xa   :  { %602 = vmatpush1.bf16.msra.mxu1 %v2955_v15  ;;  %v2968_v24 = vld [vmem:[%s4430_s3 + $0x64] ss:$16 sps:$4 sm:$0xff]   ;;  %v2973_v27 = vld [vmem:[%s4430_s3 + $0x60] ss:$16 sps:$4 sm:$0xff]   ;;  %v2954_v31 = vld [vmem:[%s4430_s3 + $0xcc] ss:$16 sps:$4 sm:$0xff]  }
   0xb   :  { %149 = vmatpush1.bf16.msra.mxu0 %v2927_v6  ;;  %603 = vmatprep.subr.bf16.mxu1 %v2956_v16  ;;  %v2974_v28 = vld [vmem:[%s4430_s3 + $0x44] ss:$16 sps:$4 sm:$0xff]   ;;  %v2979_v32 = vld [vmem:[%s4430_s3 + $0x40] ss:$16 sps:$4 sm:$0xff]   ;;  %v2960_v35 = vld [vmem:[%s4430_s3 + $0xac] ss:$16 sps:$4 sm:$0xff]  }
   0xc   :  { %150 = vmatprep.subr.bf16.mxu0 %v2928_v7  ;;  %v2943_v29 = vld [vmem:[%s4427_s0] sm:$0xff]   ;;  %v2958_v38 = vld [vmem:[%s4430_s3 + $0xa8] ss:$16 sps:$4 sm:$0xff]   ;;  %v2966_v39 = vld [vmem:[%s4430_s3 + $0x8c] ss:$16 sps:$4 sm:$0xff]  }
   0xd   :  { %v2980_v33 = vld [vmem:[%s4430_s3 + $0x24] ss:$16 sps:$4 sm:$0xff]   ;;  %v2985_v36 = vld [vmem:[%s4430_s3 + $0x20] ss:$16 sps:$4 sm:$0xff]   ;;  %v2964_v42 = vld [vmem:[%s4430_s3 + $0x88] ss:$16 sps:$4 sm:$0xff]  }
   0xe   :  { %604 = vmatpush1.bf16.msra.mxu1 %v2961_v19  ;;  %v2986_v37 = vld [vmem:[%s4430_s3 + $0x4] ss:$16 sps:$4 sm:$0xff]   ;;  %v2991_v40 = vld [vmem:[%s4430_s3] ss:$16 sps:$4 sm:$0xff]   ;;  %v2972_v43 = vld [vmem:[%s4430_s3 + $0x6c] ss:$16 sps:$4 sm:$0xff]  }
   0xf   :  { %151 = vmatpush1.bf16.msra.mxu0 %v2930_v8  ;;  %605 = vmatprep.subr.bf16.mxu1 %v2962_v20  ;;  %v2992_v41 = vld [vmem:[%s4430_s3 + $0x1e4] ss:$16 sps:$4 sm:$0xff]   ;;  %v2997_v44 = vld [vmem:[%s4430_s3 + $0x1e0] ss:$16 sps:$4 sm:$0xff]   ;;  %v2970_v45 = vld [vmem:[%s4430_s3 + $0x68] ss:$16 sps:$4 sm:$0xff]  }
  0x10   :  { %152 = vmatprep.subr.bf16.mxu0 %v2931_v9  ;;  %v2998_v46 = vld [vmem:[%s4430_s3 + $0x1c4] ss:$16 sps:$4 sm:$0xff]   ;;  %v2978_v47 = vld [vmem:[%s4430_s3 + $0x4c] ss:$16 sps:$4 sm:$0xff]   ;;  %v3003_v48 = vld [vmem:[%s4430_s3 + $0x1c0] ss:$16 sps:$4 sm:$0xff]  }
  0x11   :  { %v3004_v49 = vld [vmem:[%s4430_s3 + $0x1a4] ss:$16 sps:$4 sm:$0xff]   ;;  %v2976_v50 = vld [vmem:[%s4430_s3 + $0x48] ss:$16 sps:$4 sm:$0xff]   ;;  %v2984_v51 = vld [vmem:[%s4430_s3 + $0x2c] ss:$16 sps:$4 sm:$0xff]  }
  0x12   :  { %606 = vmatpush1.bf16.msra.mxu1 %v2967_v23  ;;  %v3009_v52 = vld [vmem:[%s4430_s3 + $0x1a0] ss:$16 sps:$4 sm:$0xff]   ;;  %v3010_v53 = vld [vmem:[%s4430_s3 + $0x184] ss:$16 sps:$4 sm:$0xff]   ;;  %v2982_v54 = vld [vmem:[%s4430_s3 + $0x28] ss:$16 sps:$4 sm:$0xff]  }
  0x13   :  { %153 = vmatpush1.bf16.msra.mxu0 %v2933_v11  ;;  %607 = vmatprep.subr.bf16.mxu1 %v2968_v24  ;;  %v2990_v55 = vld [vmem:[%s4430_s3 + $0xc] ss:$16 sps:$4 sm:$0xff]   ;;  %v3015_v56 = vld [vmem:[%s4430_s3 + $0x180] ss:$16 sps:$4 sm:$0xff]   ;;  %v3016_v57 = vld [vmem:[%s4430_s3 + $0x164] ss:$16 sps:$4 sm:$0xff]  }
  0x14   :  { %154 = vmatprep.subr.bf16.mxu0 %v2934_v14  ;;  %v2988_v58 = vld [vmem:[%s4430_s3 + $0x8] ss:$16 sps:$4 sm:$0xff]   ;;  %v2996_v59 = vld [vmem:[%s4430_s3 + $0x1ec] ss:$16 sps:$4 sm:$0xff]   ;;  %v3021_v60 = vld [vmem:[%s4430_s3 + $0x160] ss:$16 sps:$4 sm:$0xff]  }
  0x15   :  { %v2994_v61 = vld [vmem:[%s4430_s3 + $0x1e8] ss:$16 sps:$4 sm:$0xff]   ;;  %v3002_v62 = vld [vmem:[%s4430_s3 + $0x1cc] ss:$16 sps:$4 sm:$0xff]   ;;  %v3022_v6 = vld [vmem:[%s4430_s3 + $0x144] ss:$16 sps:$4 sm:$0xff]  }
  0x16   :  { %608 = vmatpush1.bf16.msra.mxu1 %v2973_v27  ;;  %v3000_v63 = vld [vmem:[%s4430_s3 + $0x1c8] ss:$16 sps:$4 sm:$0xff]   ;;  %v3008_v0 = vld [vmem:[%s4430_s3 + $0x1ac] ss:$16 sps:$4 sm:$0xff]   ;;  %v3027_v9 = vld [vmem:[%s4430_s3 + $0x140] ss:$16 sps:$4 sm:$0xff]  }
  0x17   :  { %155 = vmatpush1.bf16.msra.mxu0 %v2936_v17  ;;  %609 = vmatprep.subr.bf16.mxu1 %v2974_v28  ;;  %v3006_v1 = vld [vmem:[%s4430_s3 + $0x1a8] ss:$16 sps:$4 sm:$0xff]   ;;  %v3014_v2 = vld [vmem:[%s4430_s3 + $0x18c] ss:$16 sps:$4 sm:$0xff]   ;;  %v3028_v10 = vld [vmem:[%s4430_s3 + $0x124] ss:$16 sps:$4 sm:$0xff]  }
  0x18   :  { %156 = vmatprep.subr.bf16.mxu0 %v2937_v18  ;;  %v3012_v3 = vld [vmem:[%s4430_s3 + $0x188] ss:$16 sps:$4 sm:$0xff]   ;;  %v3020_v4 = vld [vmem:[%s4430_s3 + $0x16c] ss:$16 sps:$4 sm:$0xff]   ;;  %v3033_v13 = vld [vmem:[%s4430_s3 + $0x120] ss:$16 sps:$4 sm:$0xff]  }
  0x19   :  { %v3018_v5 = vld [vmem:[%s4430_s3 + $0x168] ss:$16 sps:$4 sm:$0xff]   ;;  %v3026_v7 = vld [vmem:[%s4430_s3 + $0x14c] ss:$16 sps:$4 sm:$0xff]   ;;  %v3034_v14 = vld [vmem:[%s4430_s3 + $0x104] ss:$16 sps:$4 sm:$0xff]  }
  0x1a   :  { %610 = vmatpush1.bf16.msra.mxu1 %v2979_v32  ;;  %v3024_v8 = vld [vmem:[%s4430_s3 + $0x148] ss:$16 sps:$4 sm:$0xff]   ;;  %v3032_v11 = vld [vmem:[%s4430_s3 + $0x12c] ss:$16 sps:$4 sm:$0xff]   ;;  %v3039_v17 = vld [vmem:[%s4430_s3 + $0x100] ss:$16 sps:$4 sm:$0xff]  }
  0x1b   :  { %157 = vmatpush1.bf16.msra.mxu0 %v2939_v21  ;;  %611 = vmatprep.subr.bf16.mxu1 %v2980_v33  ;;  %v3030_v12 = vld [vmem:[%s4430_s3 + $0x128] ss:$16 sps:$4 sm:$0xff]   ;;  %v3038_v15 = vld [vmem:[%s4430_s3 + $0x10c] ss:$16 sps:$4 sm:$0xff]  }
  0x1c   :  { %158 = vmatprep.subr.bf16.mxu0 %v2940_v22  ;;  %v3036_v16 = vld [vmem:[%s4430_s3 + $0x108] ss:$16 sps:$4 sm:$0xff]  }
  0x1d   :  { %v3042_v18 = vld [vmem:[%s4432_s5 + $0x18c] ss:$28 sps:$4 sm:$0xff]  }
  0x1e   :  { %612 = vmatpush1.bf16.msra.mxu1 %v2985_v36  ;;  %v3045_v19 = vld [vmem:[%s4432_s5 + $0x50c] ss:$28 sps:$4 sm:$0xff]  }
  0x1f   :  { %159 = vmatpush1.bf16.msra.mxu0 %v2942_v25  ;;  %613 = vmatprep.subr.bf16.mxu1 %v2986_v37 }
  0x20   :  { %642 = vmatprep.subr.bf16.mxu0 %v2948_v26 }
  0x22   :  { %177 = vmatmul.mubr.bf16.vlgmr.msra.gmra.mxu0 %v2943_v29  ;;  %614 = vmatpush1.bf16.msra.mxu1 %v2991_v40 }
  0x23   :  { %643 = vmatpush1.bf16.msra.mxu0 %v2946_v30  ;;  %615 = vmatprep.subr.bf16.mxu1 %v2992_v41 }
  0x24   :  { %644 = vmatprep.subr.bf16.mxu0 %v2954_v31 }
  0x26   :  { %616 = vmatpush2.bf16.msra.mxu1 %v2997_v44 }
  0x27   :  { %645 = vmatpush1.bf16.msra.mxu0 %v2952_v34  ;;  %617 = vmatprep.subr.bf16.mxu1 %v2998_v46 }
  0x28   :  { %646 = vmatprep.subr.bf16.mxu0 %v2960_v35 }
  0x2a   :  { %618 = vmatpush2.bf16.msra.mxu1 %v3003_v48 }
  0x2b   :  { %647 = vmatpush1.bf16.msra.mxu0 %v2958_v38  ;;  %619 = vmatprep.subr.bf16.mxu1 %v3004_v49 }
  0x2c   :  { %648 = vmatprep.subr.bf16.mxu0 %v2966_v39 }
  0x2e   :  { %620 = vmatpush2.bf16.msra.mxu1 %v3009_v52 }
  0x2f   :  { %649 = vmatpush1.bf16.msra.mxu0 %v2964_v42  ;;  %621 = vmatprep.subr.bf16.mxu1 %v3010_v53 }
  0x30   :  { %650 = vmatprep.subr.bf16.mxu0 %v2972_v43 }
  0x32   :  { %622 = vmatpush2.bf16.msra.mxu1 %v3015_v56 }
  0x33   :  { %651 = vmatpush1.bf16.msra.mxu0 %v2970_v45  ;;  %623 = vmatprep.subr.bf16.mxu1 %v3016_v57 }
  0x34   :  { %652 = vmatprep.subr.bf16.mxu0 %v2978_v47 }
  0x36   :  { %624 = vmatpush2.bf16.msra.mxu1 %v3021_v60 }
  0x37   :  { %653 = vmatpush1.bf16.msra.mxu0 %v2976_v50  ;;  %625 = vmatprep.subr.bf16.mxu1 %v3022_v6 }
  0x38   :  { %654 = vmatprep.subr.bf16.mxu0 %v2984_v51 }
  0x3a   :  { %626 = vmatpush2.bf16.msra.mxu1 %v3027_v9 }
  0x3b   :  { %655 = vmatpush1.bf16.msra.mxu0 %v2982_v54  ;;  %627 = vmatprep.subr.bf16.mxu1 %v3028_v10 }
  0x3c   :  { %656 = vmatprep.subr.bf16.mxu0 %v2990_v55 }
  0x3e   :  { %628 = vmatpush2.bf16.msra.mxu1 %v3033_v13 }
  0x3f   :  { %657 = vmatpush1.bf16.msra.mxu0 %v2988_v58  ;;  %629 = vmatprep.subr.bf16.mxu1 %v3034_v14 }
  0x40   :  { %658 = vmatprep.subr.bf16.mxu0 %v2996_v59 }
  0x42   :  { %630 = vmatpush2.bf16.msra.mxu1 %v3039_v17 }
  0x43   :  { %659 = vmatpush2.bf16.msra.mxu0 %v2994_v61  ;;  %2142 = vmatprep.subr.bf16.mxu1 %v3042_v18 }
  0x44   :  { %660 = vmatprep.subr.bf16.mxu0 %v3002_v62 }
  0x47   :  { %661 = vmatpush2.bf16.msra.mxu0 %v3000_v63 }
  0x48   :  { %662 = vmatprep.subr.bf16.mxu0 %v3008_v0 }
  0x4b   :  { %663 = vmatpush2.bf16.msra.mxu0 %v3006_v1 }
  0x4c   :  { %664 = vmatprep.subr.bf16.mxu0 %v3014_v2 }
  0x4f   :  { %665 = vmatpush2.bf16.msra.mxu0 %v3012_v3 }
  0x50   :  { %666 = vmatprep.subr.bf16.mxu0 %v3020_v4 }
  0x53   :  { %667 = vmatpush2.bf16.msra.mxu0 %v3018_v5 }
  0x54   :  { %668 = vmatprep.subr.bf16.mxu0 %v3026_v7 }
  0x57   :  { %669 = vmatpush2.bf16.msra.mxu0 %v3024_v8 }
  0x58   :  { %670 = vmatprep.subr.bf16.mxu0 %v3032_v11 }
  0x5b   :  { %671 = vmatpush2.bf16.msra.mxu0 %v3030_v12 }
  0x5c   :  { %672 = vmatprep.subr.bf16.mxu0 %v3038_v15 }
  0x5f   :  { %673 = vmatpush2.bf16.msra.mxu0 %v3036_v16 }
  0x60   :  { %2185 = vmatprep.subr.bf16.mxu0 %v3045_v19 }
  0x61   :  { %12 = vsyncpa [#allocation3], 0  ;;  %v48_v20 = vlaneseq  ;;  %v46_v24 = vld [vmem:[%s4429_s2] sm:$0x3]  ;;  %v3040_v40 = vld [vmem:[%s4432_s5 + $0x188] ss:$28 sps:$4 sm:$0xff]  }
  0x62   :  { %v3043_v41 = vld [vmem:[%s4432_s5 + $0x508] ss:$28 sps:$4 sm:$0xff]   ;;  %v3048_v43 = vld [vmem:[%s4432_s5 + $0x154] ss:$28 sps:$4 sm:$0xff]   ;;  %v3054_v47 = vld [vmem:[%s4432_s5 + $0x11c] ss:$28 sps:$4 sm:$0xff]  }
  0x63   :  { %v3689_v21 = vshrl.u32 %v48_v20, 7  ;;  %v3051_v44 = vld [vmem:[%s4432_s5 + $0x4d4] ss:$28 sps:$4 sm:$0xff]   ;;  %v3057_v48 = vld [vmem:[%s4432_s5 + $0x49c] ss:$28 sps:$4 sm:$0xff]   ;;  %vm2536_vm0 = vcmask 125952  }
  0x64   :  { %v3046_v45 = vld [vmem:[%s4432_s5 + $0x150] ss:$28 sps:$4 sm:$0xff]   ;;  %v3052_v49 = vld [vmem:[%s4432_s5 + $0x118] ss:$28 sps:$4 sm:$0xff]   ;;  %v3060_v51 = vld [vmem:[%s4432_s5 + $0xe4] ss:$28 sps:$4 sm:$0xff]  }
  0x65   :  { %v3692_v22 = vsub.s32 1, %v3689_v21  ;;  %v3695_v23 = vsub.s32 0, %v3689_v21  ;;  %v3049_v46 = vld [vmem:[%s4432_s5 + $0x4d0] ss:$28 sps:$4 sm:$0xff]   ;;  %v3055_v50 = vld [vmem:[%s4432_s5 + $0x498] ss:$28 sps:$4 sm:$0xff]  }
  0x66   :  { %v3063_v52 = vld [vmem:[%s4432_s5 + $0x464] ss:$28 sps:$4 sm:$0xff]   ;;  %v3066_v55 = vld [vmem:[%s4432_s5 + $0xac] ss:$28 sps:$4 sm:$0xff]   ;;  %v3072_v59 = vld [vmem:[%s4432_s5 + $0x74] ss:$28 sps:$4 sm:$0xff]  }
  0x67   :  { %v55_v26 = vrot.slane %v46_v24, %v3692_v22  ;;  %v51_v27 = vrot.slane %v46_v24, %v3695_v23  ;;  %v3058_v53 = vld [vmem:[%s4432_s5 + $0xe0] ss:$28 sps:$4 sm:$0xff]   ;;  %v3069_v56 = vld [vmem:[%s4432_s5 + $0x42c] ss:$28 sps:$4 sm:$0xff]   ;;  %v3075_v60 = vld [vmem:[%s4432_s5 + $0x3f4] ss:$28 sps:$4 sm:$0xff]  }
  0x68   :  { %v3061_v54 = vld [vmem:[%s4432_s5 + $0x460] ss:$28 sps:$4 sm:$0xff]   ;;  %v3064_v57 = vld [vmem:[%s4432_s5 + $0xa8] ss:$28 sps:$4 sm:$0xff]   ;;  %v3070_v61 = vld [vmem:[%s4432_s5 + $0x70] ss:$28 sps:$4 sm:$0xff]  }
  0x69   :  { %v3067_v58 = vld [vmem:[%s4432_s5 + $0x428] ss:$28 sps:$4 sm:$0xff]   ;;  %v3073_v62 = vld [vmem:[%s4432_s5 + $0x3f0] ss:$28 sps:$4 sm:$0xff]   ;;  %v3078_v63 = vld [vmem:[%s4432_s5 + $0x3c] ss:$28 sps:$4 sm:$0xff]  }
  0x6a   :  { %v3081_v0 = vld [vmem:[%s4432_s5 + $0x3bc] ss:$28 sps:$4 sm:$0xff]   ;;  %v3084_v3 = vld [vmem:[%s4432_s5 + $0x4] ss:$28 sps:$4 sm:$0xff]   ;;  %v3090_v7 = vld [vmem:[%s4432_s5 + $0x34c] ss:$28 sps:$4 sm:$0xff]  }
  0x6b   :  { %v3076_v1 = vld [vmem:[%s4432_s5 + $0x38] ss:$28 sps:$4 sm:$0xff]   ;;  %v3087_v4 = vld [vmem:[%s4432_s5 + $0x384] ss:$28 sps:$4 sm:$0xff]   ;;  %v3093_v8 = vld [vmem:[%s4432_s5 + $0x6cc] ss:$28 sps:$4 sm:$0xff]  }
  0x6c   :  { %v3079_v2 = vld [vmem:[%s4432_s5 + $0x3b8] ss:$28 sps:$4 sm:$0xff]   ;;  %v3082_v5 = vld [vmem:[%s4432_s5] ss:$28 sps:$4 sm:$0xff]   ;;  %v3088_v9 = vld [vmem:[%s4432_s5 + $0x348] ss:$28 sps:$4 sm:$0xff]  }
  0x6d   :  { %v3085_v6 = vld [vmem:[%s4432_s5 + $0x380] ss:$28 sps:$4 sm:$0xff]   ;;  %v3091_v10 = vld [vmem:[%s4432_s5 + $0x6c8] ss:$28 sps:$4 sm:$0xff]   ;;  %v3096_v11 = vld [vmem:[%s4432_s5 + $0x314] ss:$28 sps:$4 sm:$0xff]  }
  0x6e   :  { %v3099_v12 = vld [vmem:[%s4432_s5 + $0x694] ss:$28 sps:$4 sm:$0xff]   ;;  %v3102_v15 = vld [vmem:[%s4432_s5 + $0x2dc] ss:$28 sps:$4 sm:$0xff]   ;;  %v3108_v19 = vld [vmem:[%s4432_s5 + $0x2a4] ss:$28 sps:$4 sm:$0xff]  }
  0x6f   :  { %v3094_v13 = vld [vmem:[%s4432_s5 + $0x310] ss:$28 sps:$4 sm:$0xff]   ;;  %v3105_v16 = vld [vmem:[%s4432_s5 + $0x65c] ss:$28 sps:$4 sm:$0xff]   ;;  %v3111_v20 = vld [vmem:[%s4432_s5 + $0x624] ss:$28 sps:$4 sm:$0xff]  }
  0x70   :  { %v3097_v14 = vld [vmem:[%s4432_s5 + $0x690] ss:$28 sps:$4 sm:$0xff]   ;;  %v3100_v17 = vld [vmem:[%s4432_s5 + $0x2d8] ss:$28 sps:$4 sm:$0xff]   ;;  %v3106_v24 = vld [vmem:[%s4432_s5 + $0x2a0] ss:$28 sps:$4 sm:$0xff]  }
  0x71   :  { %v3103_v18 = vld [vmem:[%s4432_s5 + $0x658] ss:$28 sps:$4 sm:$0xff]  }
  0xe2   :  { %v178_v25 = vpop.f32.mrf.mxu0 }
  0xe3   :  { %v179_v32 = vadd.f32 %v178_v25, %v51_v27  ;;  %v3109_v25 = vld [vmem:[%s4432_s5 + $0x620] ss:$28 sps:$4 sm:$0xff]  }
  0xe4   :  { %v180_v28 = vpop.f32.mrf.mxu0 }
  0xe5   :  { %v181_v30 = vadd.f32 %v180_v28, %v55_v26  ;;  %v187_v38 = vmax.f32 %v179_v32, 0.0  ;;  %v3112_v28 = vld [vmem:[%s4432_s5 + $0x268] ss:$28 sps:$4 sm:$0xff]   ;;  %v3118_v32 = vld [vmem:[%s4432_s5 + $0x230] ss:$28 sps:$4 sm:$0xff]  }
  0xe6   :  { %v182_v29 = vpop.f32.mrf.mxu0 }
  0xe7   :  { %v183_v31 = vadd.f32 %v182_v29, %v51_v27  ;;  %v188_v36 = vmax.f32 %v181_v30, 0.0  ;;  %v3117_v27 = vld [vmem:[%s4432_s5 + $0x5ec] ss:$28 sps:$4 sm:$0xff]   ;;  %v3120_v30 = vld [vmem:[%s4432_s5 + $0x234] ss:$28 sps:$4 sm:$0xff]  }
  0xe8   :  { %v184_v33 = vpop.f32.mrf.mxu0  ;;  %v3115_v29 = vld [vmem:[%s4432_s5 + $0x5e8] ss:$28 sps:$4 sm:$0xff]  }
  0xe9   :  { %v185_v34 = vadd.f32 %v184_v33, %v55_v26  ;;  %v189_v35 = vmax.f32 %v183_v31, 0.0  ;;  %v3114_v26 = vld [vmem:[%s4432_s5 + $0x26c] ss:$28 sps:$4 sm:$0xff]   ;;  %v3123_v31 = vld [vmem:[%s4432_s5 + $0x5b4] ss:$28 sps:$4 sm:$0xff]  }
  0xea   :  { %v3121_v33 = vld [vmem:[%s4432_s5 + $0x5b0] ss:$28 sps:$4 sm:$0xff]  }
  0xeb   :  { %v190_v37 = vmax.f32 %v185_v34, 0.0  ;;  %v191_v42 = vpack.c.bf16 %v189_v35, %v187_v38  ;;  %v3126_v34 = vld [vmem:[%s4432_s5 + $0x1fc] ss:$28 sps:$4 sm:$0xff]   ;;  %v3132_v38 = vld [vmem:[%s4432_s5 + $0x1c4] ss:$28 sps:$4 sm:$0xff]  }
  0xec   :  { %v3129_v35 = vld [vmem:[%s4432_s5 + $0x57c] ss:$28 sps:$4 sm:$0xff]  }
  0xed   :  { %v192_v39 = vpack.c.bf16 %v190_v37, %v188_v36  ;;  %v3124_v36 = vld [vmem:[%s4432_s5 + $0x1f8] ss:$28 sps:$4 sm:$0xff]  }
  0xee   :  { %v3127_v37 = vld [vmem:[%s4432_s5 + $0x578] ss:$28 sps:$4 sm:$0xff]  }
  0xef   :  { %631 = vmatprep.mubr.bf16.mxu1 %v192_v39  ;;  %674 = vmatprep.mubr.bf16.mxu0 %v192_v39  ;;  %v3135_v39 = vld [vmem:[%s4432_s5 + $0x544] ss:$28 sps:$4 sm:$0xff]  }
  0xf0   :  { %632 = vmatmul.mubr.bf16.vlgmr.msra.gmra.mxu1 %v191_v42  ;;  %675 = vmatmul.mubr.bf16.vlgmr.msra.gmra.mxu0 %v191_v42  ;;  %v3138_v42 = vld [vmem:[%s4432_s5 + $0x194] ss:$28 sps:$4 sm:$0xff]  }
  0xf1   :  { %2143 = vmatpush1.bf16.msra.mxu1 %v3040_v40  ;;  %2186 = vmatpush1.bf16.msra.mxu0 %v3043_v41  ;;  %v3130_v40 = vld [vmem:[%s4432_s5 + $0x1c0] ss:$28 sps:$4 sm:$0xff]  }
  0xf2   :  { %2144 = vmatprep.subr.bf16.mxu1 %v3048_v43  ;;  %2187 = vmatprep.subr.bf16.mxu0 %v3051_v44  ;;  %v3133_v41 = vld [vmem:[%s4432_s5 + $0x540] ss:$28 sps:$4 sm:$0xff]   ;;  %v3141_v43 = vld [vmem:[%s4432_s5 + $0x514] ss:$28 sps:$4 sm:$0xff]   ;;  %v273_v44 = vsub.s32 3, %v3689_v21 }
  0xf5   :  { %2145 = vmatpush1.bf16.msra.mxu1 %v3046_v45  ;;  %2188 = vmatpush1.bf16.msra.mxu0 %v3049_v46  ;;  %v269_v45 = vsub.s32 2, %v3689_v21  ;;  %v257_v46 = vld [vmem:[%s4431_s4] sm:$0xf] }
  0xf6   :  { %2146 = vmatprep.subr.bf16.mxu1 %v3054_v47  ;;  %2189 = vmatprep.subr.bf16.mxu0 %v3057_v48 }
  0xf9   :  { %2147 = vmatpush1.bf16.msra.mxu1 %v3052_v49  ;;  %2190 = vmatpush1.bf16.msra.mxu0 %v3055_v50  ;;  %v266_v49 = vrot.slane %v257_v46, %v3692_v22  ;;  %v274_v50 = vrot.slane %v257_v46, %v273_v44 }
  0xfa   :  { %2148 = vmatprep.subr.bf16.mxu1 %v3060_v51  ;;  %2191 = vmatprep.subr.bf16.mxu0 %v3063_v52  ;;  %v262_v51 = vrot.slane %v257_v46, %v3695_v23  ;;  %v270_v52 = vrot.slane %v257_v46, %v269_v45  ;;  %v3180_v46 = vld [vmem:[%s4432_s5 + $0xc] ss:$28 sps:$4 sm:$0xff]  }
  0xfd   :  { %2149 = vmatpush1.bf16.msra.mxu1 %v3058_v53  ;;  %2192 = vmatpush1.bf16.msra.mxu0 %v3061_v54 }
  0xfe   :  { %2150 = vmatprep.subr.bf16.mxu1 %v3066_v55  ;;  %2193 = vmatprep.subr.bf16.mxu0 %v3069_v56 }
 0x101   :  { %2151 = vmatpush1.bf16.msra.mxu1 %v3064_v57  ;;  %2194 = vmatpush1.bf16.msra.mxu0 %v3067_v58 }
 0x102   :  { %2152 = vmatprep.subr.bf16.mxu1 %v3072_v59  ;;  %2195 = vmatprep.subr.bf16.mxu0 %v3075_v60 }
 0x105   :  { %2153 = vmatpush1.bf16.msra.mxu1 %v3070_v61  ;;  %2196 = vmatpush1.bf16.msra.mxu0 %v3073_v62 }
 0x106   :  { %2154 = vmatprep.subr.bf16.mxu1 %v3078_v63  ;;  %2197 = vmatprep.subr.bf16.mxu0 %v3081_v0 }
 0x109   :  { %2155 = vmatpush1.bf16.msra.mxu1 %v3076_v1  ;;  %2198 = vmatpush1.bf16.msra.mxu0 %v3079_v2 }
 0x10a   :  { %2156 = vmatprep.subr.bf16.mxu1 %v3084_v3  ;;  %2199 = vmatprep.subr.bf16.mxu0 %v3087_v4 }
 0x10d   :  { %2157 = vmatpush1.bf16.msra.mxu1 %v3082_v5  ;;  %2200 = vmatpush1.bf16.msra.mxu0 %v3085_v6 }
 0x10e   :  { %2158 = vmatprep.subr.bf16.mxu1 %v3090_v7  ;;  %2201 = vmatprep.subr.bf16.mxu0 %v3093_v8 }
 0x111   :  { %2159 = vmatpush2.bf16.msra.mxu1 %v3088_v9  ;;  %2202 = vmatpush2.bf16.msra.mxu0 %v3091_v10 }
 0x112   :  { %2160 = vmatprep.subr.bf16.mxu1 %v3096_v11  ;;  %2203 = vmatprep.subr.bf16.mxu0 %v3099_v12 }
 0x115   :  { %2161 = vmatpush2.bf16.msra.mxu1 %v3094_v13  ;;  %2204 = vmatpush2.bf16.msra.mxu0 %v3097_v14  ;;  %v3136_v13 = vld [vmem:[%s4432_s5 + $0x190] ss:$28 sps:$4 sm:$0xff]  }
 0x116   :  { %2162 = vmatprep.subr.bf16.mxu1 %v3102_v15  ;;  %2205 = vmatprep.subr.bf16.mxu0 %v3105_v16  ;;  %v3139_v14 = vld [vmem:[%s4432_s5 + $0x510] ss:$28 sps:$4 sm:$0xff]  }
 0x119   :  { %2163 = vmatpush2.bf16.msra.mxu1 %v3100_v17  ;;  %2206 = vmatpush2.bf16.msra.mxu0 %v3103_v18  ;;  %v3144_v17 = vld [vmem:[%s4432_s5 + $0x15c] ss:$28 sps:$4 sm:$0xff]  }
 0x11a   :  { %2164 = vmatprep.subr.bf16.mxu1 %v3108_v19  ;;  %2207 = vmatprep.subr.bf16.mxu0 %v3111_v20  ;;  %v3147_v18 = vld [vmem:[%s4432_s5 + $0x4dc] ss:$28 sps:$4 sm:$0xff]  }
 0x11b   :  { %v3142_v19 = vld [vmem:[%s4432_s5 + $0x158] ss:$28 sps:$4 sm:$0xff]  }
 0x11c   :  { %v3145_v20 = vld [vmem:[%s4432_s5 + $0x4d8] ss:$28 sps:$4 sm:$0xff]  }
 0x11d   :  { %2165 = vmatpush2.bf16.msra.mxu1 %v3106_v24  ;;  %2208 = vmatpush2.bf16.msra.mxu0 %v3109_v25  ;;  %v3150_v24 = vld [vmem:[%s4432_s5 + $0x124] ss:$28 sps:$4 sm:$0xff]  }
 0x11e   :  { %2166 = vmatprep.subr.bf16.mxu1 %v3114_v26  ;;  %2209 = vmatprep.subr.bf16.mxu0 %v3117_v27  ;;  %v3153_v25 = vld [vmem:[%s4432_s5 + $0x4a4] ss:$28 sps:$4 sm:$0xff]  }
 0x11f   :  { %v3148_v26 = vld [vmem:[%s4432_s5 + $0x120] ss:$28 sps:$4 sm:$0xff]  }
 0x120   :  { %v3151_v27 = vld [vmem:[%s4432_s5 + $0x4a0] ss:$28 sps:$4 sm:$0xff]  }
 0x121   :  { %2167 = vmatpush2.bf16.msra.mxu1 %v3112_v28  ;;  %2210 = vmatpush2.bf16.msra.mxu0 %v3115_v29  ;;  %v3156_v28 = vld [vmem:[%s4432_s5 + $0xec] ss:$28 sps:$4 sm:$0xff]  }
 0x122   :  { %2168 = vmatprep.subr.bf16.mxu1 %v3120_v30  ;;  %2211 = vmatprep.subr.bf16.mxu0 %v3123_v31  ;;  %v3159_v29 = vld [vmem:[%s4432_s5 + $0x46c] ss:$28 sps:$4 sm:$0xff]  }
 0x123   :  { %v3154_v30 = vld [vmem:[%s4432_s5 + $0xe8] ss:$28 sps:$4 sm:$0xff]  }
 0x124   :  { %v3157_v31 = vld [vmem:[%s4432_s5 + $0x468] ss:$28 sps:$4 sm:$0xff]  }
 0x125   :  { %2169 = vmatpush2.bf16.msra.mxu1 %v3118_v32  ;;  %2212 = vmatpush2.bf16.msra.mxu0 %v3121_v33  ;;  %v3162_v32 = vld [vmem:[%s4432_s5 + $0xb4] ss:$28 sps:$4 sm:$0xff]  }
 0x126   :  { %2170 = vmatprep.subr.bf16.mxu1 %v3126_v34  ;;  %2213 = vmatprep.subr.bf16.mxu0 %v3129_v35  ;;  %v3165_v33 = vld [vmem:[%s4432_s5 + $0x434] ss:$28 sps:$4 sm:$0xff]  }
 0x127   :  { %v3160_v34 = vld [vmem:[%s4432_s5 + $0xb0] ss:$28 sps:$4 sm:$0xff]  }
 0x128   :  { %v3163_v35 = vld [vmem:[%s4432_s5 + $0x430] ss:$28 sps:$4 sm:$0xff]  }
 0x129   :  { %2171 = vmatpush2.bf16.msra.mxu1 %v3124_v36  ;;  %2214 = vmatpush2.bf16.msra.mxu0 %v3127_v37  ;;  %v3168_v36 = vld [vmem:[%s4432_s5 + $0x7c] ss:$28 sps:$4 sm:$0xff]  }
 0x12a   :  { %2172 = vmatprep.subr.bf16.mxu1 %v3132_v38  ;;  %2215 = vmatprep.subr.bf16.mxu0 %v3135_v39  ;;  %v3171_v37 = vld [vmem:[%s4432_s5 + $0x3fc] ss:$28 sps:$4 sm:$0xff]  }
 0x12b   :  { %v3166_v38 = vld [vmem:[%s4432_s5 + $0x78] ss:$28 sps:$4 sm:$0xff]  }
 0x12c   :  { %v3169_v39 = vld [vmem:[%s4432_s5 + $0x3f8] ss:$28 sps:$4 sm:$0xff]  }
 0x12d   :  { %2173 = vmatpush2.bf16.msra.mxu1 %v3130_v40  ;;  %2216 = vmatpush2.bf16.msra.mxu0 %v3133_v41  ;;  %v3174_v40 = vld [vmem:[%s4432_s5 + $0x44] ss:$28 sps:$4 sm:$0xff]  }
 0x12e   :  { %2228 = vmatprep.subr.bf16.mxu1 %v3138_v42  ;;  %2271 = vmatprep.subr.bf16.mxu0 %v3141_v43  ;;  %v3177_v41 = vld [vmem:[%s4432_s5 + $0x3c4] ss:$28 sps:$4 sm:$0xff]  }
 0x12f   :  { %v3172_v42 = vld [vmem:[%s4432_s5 + $0x40] ss:$28 sps:$4 sm:$0xff]  }
 0x130   :  { %v3175_v43 = vld [vmem:[%s4432_s5 + $0x3c0] ss:$28 sps:$4 sm:$0xff]  }
 0x1b0   :  { %v633_v47 = vpop.f32.mrf.mxu1  ;;  %v676_v48 = vpop.f32.mrf.mxu0 }
 0x1b1   :  { %v634_v61 = vadd.f32 %v633_v47, %v262_v51  ;;  %v677_v62 = vadd.f32 %v676_v48, %v270_v52  ;;  %v3183_v47 = vld [vmem:[%s4432_s5 + $0x38c] ss:$28 sps:$4 sm:$0xff]  }
 0x1b2   :  { %v635_v53 = vpop.f32.mrf.mxu1  ;;  %v678_v54 = vpop.f32.mrf.mxu0  ;;  %v3178_v48 = vld [vmem:[%s4432_s5 + $0x8] ss:$28 sps:$4 sm:$0xff]  }
 0x1b3   :  { %v636_v57 = vadd.f32 %v635_v53, %v266_v49  ;;  %v679_v58 = vadd.f32 %v678_v54, %v274_v50  ;;  %v685_v9 = vmax.f32 %v634_v61, 0.0  ;;  %v687_v10 = vmax.f32 %v677_v62, 0.0  ;;  %v3187_v53 = vld [vmem:[%s4432_s5 + $0x6d0] ss:$28 sps:$4 sm:$0xff]   ;;  %v3192_v54 = vld [vmem:[%s4432_s5 + $0x31c] ss:$28 sps:$4 sm:$0xff]  }
 0x1b4   :  { %v637_v55 = vpop.f32.mrf.mxu1  ;;  %v680_v56 = vpop.f32.mrf.mxu0  ;;  %v3199_v61 = vld [vmem:[%s4432_s5 + $0x660] ss:$28 sps:$4 sm:$0xff]   ;;  %v3204_v62 = vld [vmem:[%s4432_s5 + $0x2ac] ss:$28 sps:$4 sm:$0xff]  }
 0x1b5   :  { %v638_v59 = vadd.f32 %v637_v55, %v262_v51  ;;  %v681_v60 = vadd.f32 %v680_v56, %v270_v52  ;;  %v686_v5 = vmax.f32 %v636_v57, 0.0  ;;  %v688_v6 = vmax.f32 %v679_v58, 0.0  ;;  %v3189_v51 = vld [vmem:[%s4432_s5 + $0x6d4] ss:$28 sps:$4 sm:$0xff]   ;;  %v3195_v55 = vld [vmem:[%s4432_s5 + $0x69c] ss:$28 sps:$4 sm:$0xff]  }
 0x1b6   :  { %v639_v63 = vpop.f32.mrf.mxu1  ;;  %v682_v0 = vpop.f32.mrf.mxu0  ;;  %v3184_v52 = vld [vmem:[%s4432_s5 + $0x350] ss:$28 sps:$4 sm:$0xff]   ;;  %v3190_v56 = vld [vmem:[%s4432_s5 + $0x318] ss:$28 sps:$4 sm:$0xff]   ;;  %v3198_v58 = vld [vmem:[%s4432_s5 + $0x2e4] ss:$28 sps:$4 sm:$0xff]  }
 0x1b7   :  { %v640_v1 = vadd.f32 %v639_v63, %v266_v49  ;;  %v683_v2 = vadd.f32 %v682_v0, %v274_v50  ;;  %v689_v3 = vmax.f32 %v638_v59, 0.0  ;;  %v691_v4 = vmax.f32 %v681_v60, 0.0  ;;  %v3181_v49 = vld [vmem:[%s4432_s5 + $0x388] ss:$28 sps:$4 sm:$0xff]   ;;  %v3186_v50 = vld [vmem:[%s4432_s5 + $0x354] ss:$28 sps:$4 sm:$0xff]  }
 0x1b8   :  { %v3193_v57 = vld [vmem:[%s4432_s5 + $0x698] ss:$28 sps:$4 sm:$0xff]   ;;  %v3201_v59 = vld [vmem:[%s4432_s5 + $0x664] ss:$28 sps:$4 sm:$0xff]   ;;  %v3207_v63 = vld [vmem:[%s4432_s5 + $0x62c] ss:$28 sps:$4 sm:$0xff]  }
 0x1b9   :  { %v690_v7 = vmax.f32 %v640_v1, 0.0  ;;  %v692_v8 = vmax.f32 %v683_v2, 0.0  ;;  %v3915_v15 = vpack.c.bf16 %v689_v3, %v685_v9  ;;  %v3917_v16 = vpack.c.bf16 %v691_v4, %v687_v10  ;;  %v3196_v60 = vld [vmem:[%s4432_s5 + $0x2e0] ss:$28 sps:$4 sm:$0xff]   ;;  %v3202_v0 = vld [vmem:[%s4432_s5 + $0x2a8] ss:$28 sps:$4 sm:$0xff]  }
 0x1ba   :  { %v3205_v1 = vld [vmem:[%s4432_s5 + $0x628] ss:$28 sps:$4 sm:$0xff]   ;;  %v3210_v2 = vld [vmem:[%s4432_s5 + $0x274] ss:$28 sps:$4 sm:$0xff]  }
 0x1bb   :  { %v3905_v11 = vpack.c.bf16 %v690_v7, %v686_v5  ;;  %v3907_v12 = vpack.c.bf16 %v692_v8, %v688_v6  ;;  %v3213_v3 = vld [vmem:[%s4432_s5 + $0x5f4] ss:$28 sps:$4 sm:$0xff]   ;;  %v3216_v6 = vld [vmem:[%s4432_s5 + $0x23c] ss:$28 sps:$4 sm:$0xff]   ;;  %v3222_v10 = vld [vmem:[%s4432_s5 + $0x204] ss:$28 sps:$4 sm:$0xff]  }
 0x1bc   :  { %v3208_v4 = vld [vmem:[%s4432_s5 + $0x270] ss:$28 sps:$4 sm:$0xff]   ;;  %v3219_v7 = vld [vmem:[%s4432_s5 + $0x5bc] ss:$28 sps:$4 sm:$0xff]  }
 0x1bd   :  { %2174 = vmatprep.mubr.bf16.mxu1 %v3905_v11  ;;  %2217 = vmatprep.mubr.bf16.mxu0 %v3907_v12  ;;  %v3211_v5 = vld [vmem:[%s4432_s5 + $0x5f0] ss:$28 sps:$4 sm:$0xff]   ;;  %v3214_v8 = vld [vmem:[%s4432_s5 + $0x238] ss:$28 sps:$4 sm:$0xff]  }
 0x1be   :  { %2175 = vmatmul.mubr.bf16.vlgmr.msra.gmra.mxu1 %v3915_v15  ;;  %2218 = vmatmul.mubr.bf16.vlgmr.msra.gmra.mxu0 %v3917_v16  ;;  %v3217_v9 = vld [vmem:[%s4432_s5 + $0x5b8] ss:$28 sps:$4 sm:$0xff]  }
 0x1bf   :  { %2229 = vmatpush1.bf16.msra.mxu1 %v3136_v13  ;;  %2272 = vmatpush1.bf16.msra.mxu0 %v3139_v14  ;;  %v3225_v13 = vld [vmem:[%s4432_s5 + $0x584] ss:$28 sps:$4 sm:$0xff]  }
 0x1c0   :  { %2260 = vmatprep.mubr.bf16.mxu1 %v3905_v11  ;;  %2303 = vmatprep.mubr.bf16.mxu0 %v3907_v12  ;;  %v3220_v14 = vld [vmem:[%s4432_s5 + $0x200] ss:$28 sps:$4 sm:$0xff]  }
 0x1c1   :  { %2230 = vmatprep.subr.bf16.mxu1 %v3144_v17  ;;  %2273 = vmatprep.subr.bf16.mxu0 %v3147_v18  ;;  %v3223_v17 = vld [vmem:[%s4432_s5 + $0x580] ss:$28 sps:$4 sm:$0xff]   ;;  %v3228_v18 = vld [vmem:[%s4432_s5 + $0x1cc] ss:$28 sps:$4 sm:$0xff]  }
 0x1c3   :  { %2231 = vmatpush1.bf16.msra.mxu1 %v3142_v19  ;;  %2274 = vmatpush1.bf16.msra.mxu0 %v3145_v20  ;;  %v3231_v19 = vld [vmem:[%s4432_s5 + $0x54c] ss:$28 sps:$4 sm:$0xff]  }
 0x1c4   :  { %2232 = vmatprep.subr.bf16.mxu1 %v3150_v24  ;;  %2275 = vmatprep.subr.bf16.mxu0 %v3153_v25  ;;  %v3226_v20 = vld [vmem:[%s4432_s5 + $0x1c8] ss:$28 sps:$4 sm:$0xff]   ;;  %v3234_v25 = vld [vmem:[%s4432_s5 + $0x19c] ss:$28 sps:$4 sm:$0xff]  }
 0x1c5   :  { %v3229_v24 = vld [vmem:[%s4432_s5 + $0x548] ss:$28 sps:$4 sm:$0xff]  }
 0x1c7   :  { %2233 = vmatpush1.bf16.msra.mxu1 %v3148_v26  ;;  %2276 = vmatpush1.bf16.msra.mxu0 %v3151_v27  ;;  %v3237_v26 = vld [vmem:[%s4432_s5 + $0x51c] ss:$28 sps:$4 sm:$0xff]  }
 0x1c8   :  { %2234 = vmatprep.subr.bf16.mxu1 %v3156_v28  ;;  %2277 = vmatprep.subr.bf16.mxu0 %v3159_v29  ;;  %v3232_v27 = vld [vmem:[%s4432_s5 + $0x198] ss:$28 sps:$4 sm:$0xff]   ;;  %v3240_v29 = vld [vmem:[%s4432_s5 + $0x164] ss:$28 sps:$4 sm:$0xff]  }
 0x1c9   :  { %v3235_v28 = vld [vmem:[%s4432_s5 + $0x518] ss:$28 sps:$4 sm:$0xff]  }
 0x1cb   :  { %2235 = vmatpush1.bf16.msra.mxu1 %v3154_v30  ;;  %2278 = vmatpush1.bf16.msra.mxu0 %v3157_v31  ;;  %v3243_v30 = vld [vmem:[%s4432_s5 + $0x4e4] ss:$28 sps:$4 sm:$0xff]  }
 0x1cc   :  { %2236 = vmatprep.subr.bf16.mxu1 %v3162_v32  ;;  %2279 = vmatprep.subr.bf16.mxu0 %v3165_v33  ;;  %v3238_v31 = vld [vmem:[%s4432_s5 + $0x160] ss:$28 sps:$4 sm:$0xff]   ;;  %v3246_v33 = vld [vmem:[%s4432_s5 + $0x12c] ss:$28 sps:$4 sm:$0xff]  }
 0x1cd   :  { %v3241_v32 = vld [vmem:[%s4432_s5 + $0x4e0] ss:$28 sps:$4 sm:$0xff]  }
 0x1cf   :  { %2237 = vmatpush1.bf16.msra.mxu1 %v3160_v34  ;;  %2280 = vmatpush1.bf16.msra.mxu0 %v3163_v35  ;;  %v3249_v34 = vld [vmem:[%s4432_s5 + $0x4ac] ss:$28 sps:$4 sm:$0xff]  }
 0x1d0   :  { %2238 = vmatprep.subr.bf16.mxu1 %v3168_v36  ;;  %2281 = vmatprep.subr.bf16.mxu0 %v3171_v37  ;;  %v3244_v35 = vld [vmem:[%s4432_s5 + $0x128] ss:$28 sps:$4 sm:$0xff]   ;;  %v3252_v37 = vld [vmem:[%s4432_s5 + $0xf4] ss:$28 sps:$4 sm:$0xff]  }
 0x1d1   :  { %v3247_v36 = vld [vmem:[%s4432_s5 + $0x4a8] ss:$28 sps:$4 sm:$0xff]  }
 0x1d3   :  { %2239 = vmatpush1.bf16.msra.mxu1 %v3166_v38  ;;  %2282 = vmatpush1.bf16.msra.mxu0 %v3169_v39  ;;  %v3255_v38 = vld [vmem:[%s4432_s5 + $0x474] ss:$28 sps:$4 sm:$0xff]  }
 0x1d4   :  { %2240 = vmatprep.subr.bf16.mxu1 %v3174_v40  ;;  %2283 = vmatprep.subr.bf16.mxu0 %v3177_v41  ;;  %v3250_v39 = vld [vmem:[%s4432_s5 + $0xf0] ss:$28 sps:$4 sm:$0xff]   ;;  %v3258_v41 = vld [vmem:[%s4432_s5 + $0xbc] ss:$28 sps:$4 sm:$0xff]  }
 0x1d5   :  { %v3253_v40 = vld [vmem:[%s4432_s5 + $0x470] ss:$28 sps:$4 sm:$0xff]  }
 0x1d7   :  { %2241 = vmatpush1.bf16.msra.mxu1 %v3172_v42  ;;  %2284 = vmatpush1.bf16.msra.mxu0 %v3175_v43  ;;  %v3261_v42 = vld [vmem:[%s4432_s5 + $0x43c] ss:$28 sps:$4 sm:$0xff]  }
 0x1d8   :  { %2242 = vmatprep.subr.bf16.mxu1 %v3180_v46  ;;  %2285 = vmatprep.subr.bf16.mxu0 %v3183_v47  ;;  %v3256_v43 = vld [vmem:[%s4432_s5 + $0xb8] ss:$28 sps:$4 sm:$0xff]   ;;  %v3264_v47 = vld [vmem:[%s4432_s5 + $0x84] ss:$28 sps:$4 sm:$0xff]  }
 0x1d9   :  { %v3259_v46 = vld [vmem:[%s4432_s5 + $0x438] ss:$28 sps:$4 sm:$0xff]  }
 0x1db   :  { %2243 = vmatpush1.bf16.msra.mxu1 %v3178_v48  ;;  %2286 = vmatpush1.bf16.msra.mxu0 %v3181_v49  ;;  %v3267_v48 = vld [vmem:[%s4432_s5 + $0x404] ss:$28 sps:$4 sm:$0xff]  }
 0x1dc   :  { %2244 = vmatprep.subr.bf16.mxu1 %v3186_v50  ;;  %2287 = vmatprep.subr.bf16.mxu0 %v3189_v51  ;;  %v3262_v49 = vld [vmem:[%s4432_s5 + $0x80] ss:$28 sps:$4 sm:$0xff]   ;;  %v3270_v51 = vld [vmem:[%s4432_s5 + $0x4c] ss:$28 sps:$4 sm:$0xff]  }
 0x1dd   :  { %v3265_v50 = vld [vmem:[%s4432_s5 + $0x400] ss:$28 sps:$4 sm:$0xff]  }
 0x1df   :  { %2245 = vmatpush2.bf16.msra.mxu1 %v3184_v52  ;;  %2288 = vmatpush2.bf16.msra.mxu0 %v3187_v53  ;;  %v3273_v52 = vld [vmem:[%s4432_s5 + $0x3cc] ss:$28 sps:$4 sm:$0xff]  }
 0x1e0   :  { %2246 = vmatprep.subr.bf16.mxu1 %v3192_v54  ;;  %2289 = vmatprep.subr.bf16.mxu0 %v3195_v55  ;;  %v3268_v53 = vld [vmem:[%s4432_s5 + $0x48] ss:$28 sps:$4 sm:$0xff]   ;;  %v3276_v55 = vld [vmem:[%s4432_s5 + $0x14] ss:$28 sps:$4 sm:$0xff]  }
 0x1e1   :  { %v3271_v54 = vld [vmem:[%s4432_s5 + $0x3c8] ss:$28 sps:$4 sm:$0xff]  }
 0x1e3   :  { %2247 = vmatpush2.bf16.msra.mxu1 %v3190_v56  ;;  %2290 = vmatpush2.bf16.msra.mxu0 %v3193_v57  ;;  %v3279_v56 = vld [vmem:[%s4432_s5 + $0x394] ss:$28 sps:$4 sm:$0xff]  }
 0x1e4   :  { %2248 = vmatprep.subr.bf16.mxu1 %v3198_v58  ;;  %2291 = vmatprep.subr.bf16.mxu0 %v3201_v59  ;;  %v3274_v57 = vld [vmem:[%s4432_s5 + $0x10] ss:$28 sps:$4 sm:$0xff]   ;;  %v3282_v59 = vld [vmem:[%s4432_s5 + $0x35c] ss:$28 sps:$4 sm:$0xff]  }
 0x1e5   :  { %v3277_v58 = vld [vmem:[%s4432_s5 + $0x390] ss:$28 sps:$4 sm:$0xff]  }
 0x1e7   :  { %2249 = vmatpush2.bf16.msra.mxu1 %v3196_v60  ;;  %2292 = vmatpush2.bf16.msra.mxu0 %v3199_v61  ;;  %v3285_v60 = vld [vmem:[%s4432_s5 + $0x6dc] ss:$28 sps:$4 sm:$0xff]  }
 0x1e8   :  { %2250 = vmatprep.subr.bf16.mxu1 %v3204_v62  ;;  %2293 = vmatprep.subr.bf16.mxu0 %v3207_v63  ;;  %v3280_v61 = vld [vmem:[%s4432_s5 + $0x358] ss:$28 sps:$4 sm:$0xff]   ;;  %v3288_v63 = vld [vmem:[%s4432_s5 + $0x324] ss:$28 sps:$4 sm:$0xff]  }
 0x1e9   :  { %v3283_v62 = vld [vmem:[%s4432_s5 + $0x6d8] ss:$28 sps:$4 sm:$0xff]  }
 0x1eb   :  { %2251 = vmatpush2.bf16.msra.mxu1 %v3202_v0  ;;  %2294 = vmatpush2.bf16.msra.mxu0 %v3205_v1  ;;  %v3291_v0 = vld [vmem:[%s4432_s5 + $0x6a4] ss:$28 sps:$4 sm:$0xff]  }
 0x1ec   :  { %2252 = vmatprep.subr.bf16.mxu1 %v3210_v2  ;;  %2295 = vmatprep.subr.bf16.mxu0 %v3213_v3  ;;  %v3286_v1 = vld [vmem:[%s4432_s5 + $0x320] ss:$28 sps:$4 sm:$0xff]   ;;  %v3294_v3 = vld [vmem:[%s4432_s5 + $0x2ec] ss:$28 sps:$4 sm:$0xff]  }
 0x1ed   :  { %v3289_v2 = vld [vmem:[%s4432_s5 + $0x6a0] ss:$28 sps:$4 sm:$0xff]  }
 0x1ef   :  { %2253 = vmatpush2.bf16.msra.mxu1 %v3208_v4  ;;  %2296 = vmatpush2.bf16.msra.mxu0 %v3211_v5  ;;  %v3297_v4 = vld [vmem:[%s4432_s5 + $0x66c] ss:$28 sps:$4 sm:$0xff]  }
 0x1f0   :  { %2254 = vmatprep.subr.bf16.mxu1 %v3216_v6  ;;  %2297 = vmatprep.subr.bf16.mxu0 %v3219_v7  ;;  %v3292_v5 = vld [vmem:[%s4432_s5 + $0x2e8] ss:$28 sps:$4 sm:$0xff]   ;;  %v3300_v7 = vld [vmem:[%s4432_s5 + $0x2b4] ss:$28 sps:$4 sm:$0xff]  }
 0x1f1   :  { %v3295_v6 = vld [vmem:[%s4432_s5 + $0x668] ss:$28 sps:$4 sm:$0xff]  }
 0x1f3   :  { %2255 = vmatpush2.bf16.msra.mxu1 %v3214_v8  ;;  %2298 = vmatpush2.bf16.msra.mxu0 %v3217_v9  ;;  %v3303_v8 = vld [vmem:[%s4432_s5 + $0x634] ss:$28 sps:$4 sm:$0xff]  }
 0x1f4   :  { %2256 = vmatprep.subr.bf16.mxu1 %v3222_v10  ;;  %2299 = vmatprep.subr.bf16.mxu0 %v3225_v13  ;;  %v3298_v9 = vld [vmem:[%s4432_s5 + $0x2b0] ss:$28 sps:$4 sm:$0xff]   ;;  %v3306_v13 = vld [vmem:[%s4432_s5 + $0x27c] ss:$28 sps:$4 sm:$0xff]  }
 0x1f5   :  { %v3301_v10 = vld [vmem:[%s4432_s5 + $0x630] ss:$28 sps:$4 sm:$0xff]  }
 0x1f7   :  { %2257 = vmatpush2.bf16.msra.mxu1 %v3220_v14  ;;  %2300 = vmatpush2.bf16.msra.mxu0 %v3223_v17  ;;  %v3309_v14 = vld [vmem:[%s4432_s5 + $0x5fc] ss:$28 sps:$4 sm:$0xff]  }
 0x1f8   :  { %2258 = vmatprep.subr.bf16.mxu1 %v3228_v18  ;;  %2301 = vmatprep.subr.bf16.mxu0 %v3231_v19  ;;  %v3304_v17 = vld [vmem:[%s4432_s5 + $0x278] ss:$28 sps:$4 sm:$0xff]   ;;  %v3312_v19 = vld [vmem:[%s4432_s5 + $0x244] ss:$28 sps:$4 sm:$0xff]  }
 0x1f9   :  { %v3307_v18 = vld [vmem:[%s4432_s5 + $0x5f8] ss:$28 sps:$4 sm:$0xff]  }
 0x1fb   :  { %2259 = vmatpush2.bf16.msra.mxu1 %v3226_v20  ;;  %2302 = vmatpush2.bf16.msra.mxu0 %v3229_v24  ;;  %v3315_v20 = vld [vmem:[%s4432_s5 + $0x5c4] ss:$28 sps:$4 sm:$0xff]  }
 0x1fc   :  { %2314 = vmatprep.subr.bf16.mxu1 %v3234_v25  ;;  %2357 = vmatprep.subr.bf16.mxu0 %v3237_v26  ;;  %v3310_v24 = vld [vmem:[%s4432_s5 + $0x240] ss:$28 sps:$4 sm:$0xff]   ;;  %v3318_v26 = vld [vmem:[%s4432_s5 + $0x20c] ss:$28 sps:$4 sm:$0xff]  }
 0x1fd   :  { %v3313_v25 = vld [vmem:[%s4432_s5 + $0x5c0] ss:$28 sps:$4 sm:$0xff]  }
 0x1fe   :  { %2261 = vmatmul.mubr.bf16.vlgmr.msra.gmra.mxu1 %v3915_v15  ;;  %2304 = vmatmul.mubr.bf16.vlgmr.msra.gmra.mxu0 %v3917_v16 }
 0x1ff   :  { %2315 = vmatpush1.bf16.msra.mxu1 %v3232_v27  ;;  %2346 = vmatprep.mubr.bf16.mxu1 %v3905_v11  ;;  %v3321_v27 = vld [vmem:[%s4432_s5 + $0x58c] ss:$28 sps:$4 sm:$0xff]  }
 0x200   :  { %2358 = vmatpush1.bf16.msra.mxu0 %v3235_v28  ;;  %2389 = vmatprep.mubr.bf16.mxu0 %v3907_v12  ;;  %v3316_v28 = vld [vmem:[%s4432_s5 + $0x208] ss:$28 sps:$4 sm:$0xff]  }
 0x201   :  { %2316 = vmatprep.subr.bf16.mxu1 %v3240_v29  ;;  %2359 = vmatprep.subr.bf16.mxu0 %v3243_v30  ;;  %v3319_v29 = vld [vmem:[%s4432_s5 + $0x588] ss:$28 sps:$4 sm:$0xff]   ;;  %v3324_v30 = vld [vmem:[%s4432_s5 + $0x1d4] ss:$28 sps:$4 sm:$0xff]  }
 0x203   :  { %2317 = vmatpush1.bf16.msra.mxu1 %v3238_v31  ;;  %v3327_v31 = vld [vmem:[%s4432_s5 + $0x554] ss:$28 sps:$4 sm:$0xff]  }
 0x204   :  { %2360 = vmatpush1.bf16.msra.mxu0 %v3241_v32  ;;  %2318 = vmatprep.subr.bf16.mxu1 %v3246_v33  ;;  %v3322_v32 = vld [vmem:[%s4432_s5 + $0x1d0] ss:$28 sps:$4 sm:$0xff]  }
 0x205   :  { %2361 = vmatprep.subr.bf16.mxu0 %v3249_v34  ;;  %v3325_v33 = vld [vmem:[%s4432_s5 + $0x550] ss:$28 sps:$4 sm:$0xff]   ;;  %v3328_v34 = vld [vmem:[%s4432_s5 + $0x360] ss:$28 sps:$4 sm:$0xff]  }
 0x207   :  { %2319 = vmatpush1.bf16.msra.mxu1 %v3244_v35  ;;  %v3329_v35 = vld [vmem:[%s4432_s5 + $0x6e0] ss:$28 sps:$4 sm:$0xff]  }
 0x208   :  { %2362 = vmatpush1.bf16.msra.mxu0 %v3247_v36  ;;  %2320 = vmatprep.subr.bf16.mxu1 %v3252_v37  ;;  %v3330_v36 = vld [vmem:[%s4432_s5 + $0x1a0] ss:$28 sps:$4 sm:$0xff]  }
 0x209   :  { %2363 = vmatprep.subr.bf16.mxu0 %v3255_v38  ;;  %v3331_v37 = vld [vmem:[%s4432_s5 + $0x520] ss:$28 sps:$4 sm:$0xff]   ;;  %v3332_v38 = vld [vmem:[%s4432_s5 + $0x328] ss:$28 sps:$4 sm:$0xff]  }
 0x20b   :  { %2321 = vmatpush1.bf16.msra.mxu1 %v3250_v39  ;;  %v3333_v39 = vld [vmem:[%s4432_s5 + $0x6a8] ss:$28 sps:$4 sm:$0xff]  }
 0x20c   :  { %2364 = vmatpush1.bf16.msra.mxu0 %v3253_v40  ;;  %2322 = vmatprep.subr.bf16.mxu1 %v3258_v41  ;;  %v3334_v40 = vld [vmem:[%s4432_s5 + $0x168] ss:$28 sps:$4 sm:$0xff]  }
 0x20d   :  { %2365 = vmatprep.subr.bf16.mxu0 %v3261_v42  ;;  %v3335_v41 = vld [vmem:[%s4432_s5 + $0x4e8] ss:$28 sps:$4 sm:$0xff]   ;;  %v3336_v42 = vld [vmem:[%s4432_s5 + $0x2f0] ss:$28 sps:$4 sm:$0xff]  }
 0x20f   :  { %2323 = vmatpush1.bf16.msra.mxu1 %v3256_v43  ;;  %v3337_v43 = vld [vmem:[%s4432_s5 + $0x670] ss:$28 sps:$4 sm:$0xff]  }
 0x210   :  { %2366 = vmatpush1.bf16.msra.mxu0 %v3259_v46  ;;  %2324 = vmatprep.subr.bf16.mxu1 %v3264_v47  ;;  %v3339_v46 = vld [vmem:[%s4432_s5 + $0x4b0] ss:$28 sps:$4 sm:$0xff]   ;;  %v3341_v47 = vld [vmem:[%s4432_s5 + $0x638] ss:$28 sps:$4 sm:$0xff]  }
 0x211   :  { %2367 = vmatprep.subr.bf16.mxu0 %v3267_v48  ;;  %v3342_v48 = vld [vmem:[%s4432_s5 + $0xf8] ss:$28 sps:$4 sm:$0xff]  }
 0x213   :  { %2325 = vmatpush1.bf16.msra.mxu1 %v3262_v49  ;;  %v3343_v49 = vld [vmem:[%s4432_s5 + $0x478] ss:$28 sps:$4 sm:$0xff]  }
 0x214   :  { %2368 = vmatpush1.bf16.msra.mxu0 %v3265_v50  ;;  %2326 = vmatprep.subr.bf16.mxu1 %v3270_v51  ;;  %v3344_v50 = vld [vmem:[%s4432_s5 + $0x280] ss:$28 sps:$4 sm:$0xff]  }
 0x215   :  { %2369 = vmatprep.subr.bf16.mxu0 %v3273_v52  ;;  %v3345_v51 = vld [vmem:[%s4432_s5 + $0x600] ss:$28 sps:$4 sm:$0xff]  }
 0x216   :  { %v3346_v52 = vld [vmem:[%s4432_s5 + $0xc0] ss:$28 sps:$4 sm:$0xff]  }
 0x217   :  { %2327 = vmatpush1.bf16.msra.mxu1 %v3268_v53  ;;  %v3347_v53 = vld [vmem:[%s4432_s5 + $0x440] ss:$28 sps:$4 sm:$0xff]  }
 0x218   :  { %2370 = vmatpush1.bf16.msra.mxu0 %v3271_v54  ;;  %2328 = vmatprep.subr.bf16.mxu1 %v3276_v55  ;;  %v3348_v54 = vld [vmem:[%s4432_s5 + $0x248] ss:$28 sps:$4 sm:$0xff]  }
 0x219   :  { %2371 = vmatprep.subr.bf16.mxu0 %v3279_v56  ;;  %v3349_v55 = vld [vmem:[%s4432_s5 + $0x5c8] ss:$28 sps:$4 sm:$0xff]  }
 0x21a   :  { %v3350_v56 = vld [vmem:[%s4432_s5 + $0x88] ss:$28 sps:$4 sm:$0xff]  }
 0x21b   :  { %2329 = vmatpush1.bf16.msra.mxu1 %v3274_v57  ;;  %v3351_v57 = vld [vmem:[%s4432_s5 + $0x408] ss:$28 sps:$4 sm:$0xff]  }
 0x21c   :  { %2372 = vmatpush1.bf16.msra.mxu0 %v3277_v58  ;;  %2330 = vmatprep.subr.bf16.mxu1 %v3282_v59  ;;  %v3352_v58 = vld [vmem:[%s4432_s5 + $0x210] ss:$28 sps:$4 sm:$0xff]  }
 0x21d   :  { %2373 = vmatprep.subr.bf16.mxu0 %v3285_v60  ;;  %v3353_v59 = vld [vmem:[%s4432_s5 + $0x590] ss:$28 sps:$4 sm:$0xff]  }
 0x21e   :  { %v3354_v60 = vld [vmem:[%s4432_s5 + $0x50] ss:$28 sps:$4 sm:$0xff]  }
 0x21f   :  { %2331 = vmatpush2.bf16.msra.mxu1 %v3280_v61  ;;  %v3355_v61 = vld [vmem:[%s4432_s5 + $0x3d0] ss:$28 sps:$4 sm:$0xff]  }
 0x220   :  { %2374 = vmatpush2.bf16.msra.mxu0 %v3283_v62  ;;  %2332 = vmatprep.subr.bf16.mxu1 %v3288_v63  ;;  %v3356_v62 = vld [vmem:[%s4432_s5 + $0x1d8] ss:$28 sps:$4 sm:$0xff]  }
 0x221   :  { %2375 = vmatprep.subr.bf16.mxu0 %v3291_v0  ;;  %v3357_v63 = vld [vmem:[%s4432_s5 + $0x558] ss:$28 sps:$4 sm:$0xff]  }
 0x222   :  { %v3358_v0 = vld [vmem:[%s4432_s5 + $0x18] ss:$28 sps:$4 sm:$0xff]  }
 0x223   :  { %2333 = vmatpush2.bf16.msra.mxu1 %v3286_v1  ;;  %v3359_v1 = vld [vmem:[%s4432_s5 + $0x398] ss:$28 sps:$4 sm:$0xff]  }
 0x224   :  { %2376 = vmatpush2.bf16.msra.mxu0 %v3289_v2  ;;  %2334 = vmatprep.subr.bf16.mxu1 %v3294_v3  ;;  %v4406_v2 = vld [vmem:[%s4433_s6] sm:$0x7f] }
 0x225   :  { %2377 = vmatprep.subr.bf16.mxu0 %v3297_v4  ;;  %v958_v3 = vrot.slane %v4406_v2, %v3695_v23 }
 0x227   :  { %2335 = vmatpush2.bf16.msra.mxu1 %v3292_v5 }
 0x228   :  { %2378 = vmatpush2.bf16.msra.mxu0 %v3295_v6  ;;  %2336 = vmatprep.subr.bf16.mxu1 %v3300_v7  ;;  %v962_v6 = vrot.slane %v4406_v2, %v3692_v22 }
 0x229   :  { %2379 = vmatprep.subr.bf16.mxu0 %v3303_v8 }
 0x22b   :  { %2337 = vmatpush2.bf16.msra.mxu1 %v3298_v9 }
 0x22c   :  { %2380 = vmatpush2.bf16.msra.mxu0 %v3301_v10  ;;  %2338 = vmatprep.subr.bf16.mxu1 %v3306_v13 }
 0x22d   :  { %2381 = vmatprep.subr.bf16.mxu0 %v3309_v14 }
 0x22f   :  { %2339 = vmatpush2.bf16.msra.mxu1 %v3304_v17 }
 0x230   :  { %2382 = vmatpush2.bf16.msra.mxu0 %v3307_v18  ;;  %2340 = vmatprep.subr.bf16.mxu1 %v3312_v19 }
 0x231   :  { %2383 = vmatprep.subr.bf16.mxu0 %v3315_v20 }
 0x233   :  { %2341 = vmatpush2.bf16.msra.mxu1 %v3310_v24 }
 0x234   :  { %2384 = vmatpush2.bf16.msra.mxu0 %v3313_v25  ;;  %2342 = vmatprep.subr.bf16.mxu1 %v3318_v26 }
 0x235   :  { %2385 = vmatprep.subr.bf16.mxu0 %v3321_v27 }
 0x237   :  { %2343 = vmatpush2.bf16.msra.mxu1 %v3316_v28 }
 0x238   :  { %2386 = vmatpush2.bf16.msra.mxu0 %v3319_v29  ;;  %2344 = vmatprep.subr.bf16.mxu1 %v3324_v30  ;;  %v966_v30 = vrot.slane %v4406_v2, %v269_v45 }
 0x239   :  { %2387 = vmatprep.subr.bf16.mxu0 %v3327_v31 }
 0x23b   :  { %2345 = vmatpush2.bf16.msra.mxu1 %v3322_v32 }
 0x23c   :  { %2388 = vmatpush2.bf16.msra.mxu0 %v3325_v33  ;;  %2871 = vmatprep.subr.bf16.mxu1 %v3328_v34  ;;  %v970_v33 = vrot.slane %v4406_v2, %v273_v44 }
 0x23d   :  { %2893 = vmatprep.subr.bf16.mxu0 %v3329_v35 }
 0x23e   :  { %2347 = vmatmul.mubr.bf16.vlgmr.msra.gmra.mxu1 %v3915_v15 }
 0x23f   :  { %2390 = vmatmul.mubr.bf16.vlgmr.msra.gmra.mxu0 %v3917_v16  ;;  %2872 = vmatpush3.bf16.msra.mxu1 %v3330_v36 }
 0x240   :  { %2432 = vmatprep.mubr.bf16.mxu1 %v3905_v11  ;;  %2894 = vmatpush3.bf16.msra.mxu0 %v3331_v37  ;;  %v3338_v11 = vld [vmem:[%s4432_s5 + $0x130] ss:$28 sps:$4 sm:$0xff]  }
 0x241   :  { %2473 = vmatprep.mubr.bf16.mxu0 %v3907_v12  ;;  %2873 = vmatprep.subr.bf16.mxu1 %v3332_v38  ;;  %v3340_v12 = vld [vmem:[%s4432_s5 + $0x2b8] ss:$28 sps:$4 sm:$0xff]   ;;  %s3397_s5 = smov [#allocation2]  }
 0x242   :  { %2895 = vmatprep.subr.bf16.mxu0 %v3333_v39  ;;  %s2547_s6 = sshll.u32 %s3397_s5, 4  ;;  %s2548_s6 = int_to_ptr.vmem [resolvable:$true] %s2547_s6 }
 0x243   :  { %2874 = vmatpush3.bf16.msra.mxu1 %v3334_v40  ;;  %s3374_s23 = scalar_lea.vmem %s2548_s6, 896  ;;  %p3379_p1 = scmp.lt.s32.totalorder %s2548_s6, %s2548_s6 }
 0x244   :  { %2896 = vmatpush3.bf16.msra.mxu0 %v3335_v41  ;;  %2875 = vmatprep.subr.bf16.mxu1 %v3336_v42  ;;  %p3375_p0 = scmp.ne.s32.totalorder %s2548_s6, %s3374_s23  ;;  %p3380_p2 = scmp.lt.s32.totalorder %s3374_s23, %s3374_s23 }
 0x245   :  { %2897 = vmatprep.subr.bf16.mxu0 %v3337_v43 }
 0x246   :  { %p3381_p3 = por %p3380_p2, %p3379_p1 }
 0x247   :  { %2876 = vmatpush3.bf16.msra.mxu1 %v3338_v11 }
 0x248   :  { %2898 = vmatpush3.bf16.msra.mxu0 %v3339_v46  ;;  %2877 = vmatprep.subr.bf16.mxu1 %v3340_v12  ;;  %p3382_p4 = pnand %p3381_p3, %p3375_p0 }
 0x249   :  { %2899 = vmatprep.subr.bf16.mxu0 %v3341_v47 }
 0x24b   :  { %2878 = vmatpush3.bf16.msra.mxu1 %v3342_v48 }
 0x24c   :  { %2900 = vmatpush3.bf16.msra.mxu0 %v3343_v49  ;;  %2879 = vmatprep.subr.bf16.mxu1 %v3344_v50 }
 0x24d   :  { %2901 = vmatprep.subr.bf16.mxu0 %v3345_v51 }
 0x24f   :  { %2880 = vmatpush3.bf16.msra.mxu1 %v3346_v52  ;;  %v973_v52 = vsub.s32 4, %v3689_v21 }
 0x250   :  { %2902 = vmatpush3.bf16.msra.mxu0 %v3347_v53  ;;  %2881 = vmatprep.subr.bf16.mxu1 %v3348_v54  ;;  %v977_v53 = vsub.s32 5, %v3689_v21 }
 0x251   :  { %2903 = vmatprep.subr.bf16.mxu0 %v3349_v55  ;;  %v974_v54 = vrot.slane %v4406_v2, %v973_v52 }
 0x253   :  { %2882 = vmatpush3.bf16.msra.mxu1 %v3350_v56 }
 0x254   :  { %2904 = vmatpush3.bf16.msra.mxu0 %v3351_v57  ;;  %2883 = vmatprep.subr.bf16.mxu1 %v3352_v58  ;;  %v978_v57 = vrot.slane %v4406_v2, %v977_v53 }
 0x255   :  { %2905 = vmatprep.subr.bf16.mxu0 %v3353_v59 }
 0x257   :  { %2884 = vmatpush3.bf16.msra.mxu1 %v3354_v60 }
 0x258   :  { %2906 = vmatpush3.bf16.msra.mxu0 %v3355_v61  ;;  %2885 = vmatprep.subr.bf16.mxu1 %v3356_v62 }
 0x259   :  { %2907 = vmatprep.subr.bf16.mxu0 %v3357_v63 }
 0x25b   :  { %2886 = vmatpush3.bf16.msra.mxu1 %v3358_v0 }
 0x25c   :  { %2908 = vmatpush3.bf16.msra.mxu0 %v3359_v1 }
 0x25e   :  { %2433 = vmatmul.mubr.bf16.vlgmr.msra.gmra.mxu1 %v3915_v15 }
 0x25f   :  { %2474 = vmatmul.mubr.bf16.vlgmr.msra.gmra.mxu0 %v3917_v16 }
 0x27e   :  { %v2176_v4 = vpop.f32.mrf.mxu1  ;;  %v2219_v5 = vpop.f32.mrf.mxu0 }
 0x27f   :  { %v2177_v9 = vadd.f32 %v2176_v4, %v958_v3 }
 0x280   :  { %v2178_v7 = vpop.f32.mrf.mxu1  ;;  %v2221_v8 = vpop.f32.mrf.mxu0 }
 0x281   :  { %v2179_v13 = vadd.f32 %v2178_v7, %v962_v6  ;;  %v2220_v17 = vadd.f32 %v2219_v5, %v2177_v9 }
 0x282   :  { %v2180_v10 = vpop.f32.mrf.mxu1  ;;  %v2223_v15 = vpop.f32.mrf.mxu0 }
 0x283   :  { %v2181_v16 = vadd.f32 %v2180_v10, %v958_v3  ;;  %v2222_v24 = vadd.f32 %v2221_v8, %v2179_v13 }
 0x284   :  { %v2182_v14 = vpop.f32.mrf.mxu1  ;;  %v2225_v20 = vpop.f32.mrf.mxu0 }
 0x285   :  { %v2224_v18 = vadd.f32 %v2223_v15, %v2181_v16  ;;  %v2183_v19 = vadd.f32 %v2182_v14, %v962_v6 }
 0x287   :  { %v2482_v25 = vpack.c.bf16 %v2224_v18, %v2220_v17  ;;  %v2226_v23 = vadd.f32 %v2225_v20, %v2183_v19  ;;  %v981_v17 = vsub.s32 6, %v3689_v21 }
 0x289   :  { %v2483_v26 = vpack.c.bf16 %v2226_v23, %v2222_v24  ;;  %3360 = vtanh.bf16 %v2482_v25  ;;  %v982_v24 = vrot.slane %v4406_v2, %v981_v17 }
 0x28b   :  { %3362 = vtanh.bf16 %v2483_v26 }
 0x297   :  { %v3361_v27 = vpop.eup %3360 }
 0x299   :  { %v3363_v22 = vpop.eup %3362 }
 0x29a   :  { %v2863_v28 = vcombine.low %v3361_v27, %v3363_v22  ;;  %v2867_v29 = vcombine.high %v3361_v27, %v3363_v22 }
 0x29c   :  { %2533 = vst [vmem:[#allocation2] sm:$0xff] %v2863_v28  ;;  %2538 = vst [vmem:[#allocation2 + $0x1c] sm:$0xff] %v2867_v29 }
 0x2be   :  { %v2262_v31 = vpop.f32.mrf.mxu1  ;;  %v2305_v32 = vpop.f32.mrf.mxu0 }
 0x2bf   :  { %v2263_v36 = vadd.f32 %v2262_v31, %v966_v30 }
 0x2c0   :  { %v2264_v34 = vpop.f32.mrf.mxu1  ;;  %v2307_v35 = vpop.f32.mrf.mxu0 }
 0x2c1   :  { %v2265_v39 = vadd.f32 %v2264_v34, %v970_v33  ;;  %v2306_v42 = vadd.f32 %v2305_v32, %v2263_v36 }
 0x2c2   :  { %v2266_v37 = vpop.f32.mrf.mxu1  ;;  %v2309_v38 = vpop.f32.mrf.mxu0 }
 0x2c3   :  { %v2267_v40 = vadd.f32 %v2266_v37, %v966_v30  ;;  %v2308_v12 = vadd.f32 %v2307_v35, %v2265_v39 }
 0x2c4   :  { %v2268_v41 = vpop.f32.mrf.mxu1  ;;  %v2311_v46 = vpop.f32.mrf.mxu0 }
 0x2c5   :  { %v2310_v43 = vadd.f32 %v2309_v38, %v2267_v40  ;;  %v2269_v11 = vadd.f32 %v2268_v41, %v970_v33 }
 0x2c7   :  { %v2484_v45 = vpack.c.bf16 %v2310_v43, %v2306_v42  ;;  %v2312_v47 = vadd.f32 %v2311_v46, %v2269_v11 }
 0x2c9   :  { %v2485_v48 = vpack.c.bf16 %v2312_v47, %v2308_v12  ;;  %3364 = vtanh.bf16 %v2484_v45 }
 0x2cb   :  { %3366 = vtanh.bf16 %v2485_v48 }
 0x2d7   :  { %v3365_v49 = vpop.eup %3364 }
 0x2d9   :  { %v3367_v44 = vpop.eup %3366 }
 0x2da   :  { %v2864_v50 = vcombine.low %v3365_v49, %v3367_v44  ;;  %v2868_v51 = vcombine.high %v3365_v49, %v3367_v44 }
 0x2dc   :  { %2534 = vst [vmem:[#allocation2 + $0x8] sm:$0xff] %v2864_v50  ;;  %2539 = vst [vmem:[#allocation2 + $0x24] sm:$0xff] %v2868_v51 }
 0x2fe   :  { %v2348_v55 = vpop.f32.mrf.mxu1 }
 0x2ff   :  { %v2391_v56 = vpop.f32.mrf.mxu0  ;;  %v2349_v59 = vadd.f32 %v2348_v55, %v974_v54 }
 0x300   :  { %v2350_v58 = vpop.f32.mrf.mxu1 }
 0x301   :  { %v2393_v60 = vpop.f32.mrf.mxu0  ;;  %v2351_v62 = vadd.f32 %v2350_v58, %v978_v57  ;;  %v2392_v3 = vadd.f32 %v2391_v56, %v2349_v59 }
 0x302   :  { %v2352_v61 = vpop.f32.mrf.mxu1 }
 0x303   :  { %v2353_v63 = vadd.f32 %v2352_v61, %v974_v54  ;;  %v2395_v0 = vpop.f32.mrf.mxu0  ;;  %v2394_v7 = vadd.f32 %v2393_v60, %v2351_v62 }
 0x304   :  { %v2354_v1 = vpop.f32.mrf.mxu1 }
 0x305   :  { %v2396_v4 = vadd.f32 %v2395_v0, %v2353_v63  ;;  %v2355_v5 = vadd.f32 %v2354_v1, %v978_v57  ;;  %v2397_v6 = vpop.f32.mrf.mxu0 }
 0x307   :  { %v2486_v8 = vpack.c.bf16 %v2396_v4, %v2392_v3  ;;  %v2398_v9 = vadd.f32 %v2397_v6, %v2355_v5 }
 0x309   :  { %v2487_v10 = vpack.c.bf16 %v2398_v9, %v2394_v7  ;;  %3368 = vtanh.bf16 %v2486_v8 }
 0x30b   :  { %3370 = vtanh.bf16 %v2487_v10 }
 0x317   :  { %v3369_v15 = vpop.eup %3368 }
 0x319   :  { %v3371_v13 = vpop.eup %3370 }
 0x31a   :  { %v2865_v16 = vcombine.low %v3369_v15, %v3371_v13  ;;  %v2869_v14 = vcombine.high %v3369_v15, %v3371_v13 }
 0x31c   :  { %2535 = vst [vmem:[#allocation2 + $0x10] sm:$0xff] %v2865_v16  ;;  %2540 = vst [vmem:[#allocation2 + $0x2c] sm:$0xff] %v2869_v14 }
 0x31e   :  { %v2887_v18 = vpop.f32.mrf.mxu1 }
 0x31f   :  { %v2909_v19 = vpop.f32.mrf.mxu0 }
 0x320   :  { %v2888_v20 = vpop.f32.mrf.mxu1 }
 0x321   :  { %v2889_v25 = vadd.f32 %v2888_v20, %v2887_v18  ;;  %v2910_v23 = vpop.f32.mrf.mxu0 }
 0x322   :  { %v2890_v26 = vpop.f32.mrf.mxu1  ;;  %v2911_v31 = vadd.f32 %v2910_v23, %v2909_v19 }
 0x323   :  { %v2912_v27 = vpop.f32.mrf.mxu0  ;;  %v2435_v28 = vadd.f32 %v2889_v25, %v982_v24 }
 0x324   :  { %v2891_v22 = vpop.f32.mrf.mxu1 }
 0x325   :  { %v2892_v29 = vadd.f32 %v2891_v22, %v2890_v26  ;;  %v2913_v30 = vpop.f32.mrf.mxu0  ;;  %v2476_v34 = vadd.f32 %v2911_v31, %v2435_v28 }
 0x326   :  { %v2914_v33 = vadd.f32 %v2913_v30, %v2912_v27 }
 0x327   :  { %v2438_v32 = vadd.f32 %v2892_v29, %v982_v24 }
 0x329   :  { %v2479_v35 = vadd.f32 %v2914_v33, %v2438_v32 }
 0x32b   :  { %v2488_v36 = vpack.c.bf16 %v2479_v35, %v2476_v34 }
 0x32d   :  { %3372 = vtanh.bf16 %v2488_v36 }
 0x33b   :  { %v3373_v21 = vpop.eup %3372 }
 0x33c   :  { %v2866_v2 = vcombine.low %v3373_v21, %v3373_v21  ;;  %v2870_v37 = vcombine.high %v3373_v21, %v3373_v21 }
 0x33e   :  { %2537 = vst.msk [vmem:[#allocation2 + $0x18] sm:$0xf] %vm2536_vm0, %v2866_v2  ;;  %2541 = vst.msk [vmem:[#allocation2 + $0x34] sm:$0xf] %vm2536_vm0, %v2870_v37 }
 0x33f   :  { %3385 = shalt.err (!%p3382_p4)
}
 0x340   :  { %s3398_s24 = smov 448   ;;  %s3399_s25 = smov 28  }
 0x341   :  { %2553 = dma.vmem_to_hbm [thread:$0]  %s2548_s6, 896, %s4434_s7, [#allocation3], %s3398_s24, %s3398_s24, %s3399_s25  }
 0x342   :  { %3394 = dma.done.wait [#allocation3], 896  }
 0x343   :  { %3395 = vsyncadd [#allocation3], 4294966400 }
 0x344   :  { %2557 = vsyncpa [#allocation3], 1 }

</bundles_post_ra>
